<compile_context>
chip_gen: v7x
topology: tpu7x:2x2x1
jax: 0.10.0
libtpu: 0.0.40
codegen_flags: <defaults>
</compile_context>

<pallas_src>
import math
import numpy as np

import jax
import jax.numpy as jnp
from jax import lax
from jax.experimental import pallas as pl
from jax.experimental.pallas import tpu as pltpu

VMEM = pltpu.MemorySpace.VMEM
F32 = jnp.float32
BF16 = jnp.bfloat16


# ----------------------------------------------------------------------------
# Single fused Pallas kernel for the whole forward pass
# ----------------------------------------------------------------------------
def fused_forward(st, xt, H, y, noise_sigma, p, *, nhead, NR, mod_n):
    """st:(NT,B,D)  xt:(NT,B,mod_n)  H:(B,2NR,2NT)  y:(B,2NR)  noise_sigma:(B,)"""
    NT, B, D = st.shape
    hd = D // nhead
    BN = B * NT
    scale = 1.0 / math.sqrt(hd)
    inv_sqrt = float(1.0 / np.sqrt(2.0 * NT))
    eps = 1e-5

    # One-time tiny layout plumbing in the wrapper (batch-major 2-D row slabs so the
    # kernel only ever does 2-D matmuls / elementwise ops on VMEM-resident tiles).
    st_s = jnp.transpose(st, (1, 0, 2)).reshape(BN, D)           # (BN, D)
    xt_s = jnp.transpose(xt, (1, 0, 2)).reshape(BN, mod_n)       # (BN, Q)
    ht = jnp.transpose(H, (0, 2, 1))                             # (B, 2NT, 2NR); ht[b,t,r]=H[b,r,t]
    tgt_s = ht[:, :NT, :].reshape(BN, 2 * NR)                    # == H[:,:,:NT].permute(2,0,1), batch-major
    ns_rows = jnp.broadcast_to(noise_sigma.reshape(B, 1, 1).astype(F32),
                               (B, NT, 1)).reshape(BN, 1)

    def kern(st_ref, xt_ref, tgt_ref, ht_ref, y_ref, ns_ref, rc_ref, ic_ref,
             wqkv_ref, bqkv_ref, wo_ref, bo_ref, ln1g_ref, ln1b_ref,
             wf1d_ref, wf1t_ref, wf1x_ref, wf1s_ref, bf1_ref,
             wf2_ref, bf2_ref, ln2g_ref, ln2b_ref,
             wd1d_ref, wd1t_ref, wd1x_ref, wd1e_ref, wd1n_ref, bd1_ref,
             wd2_ref, bd2_ref, wd3_ref, bd3_ref,
             enc_ref, dec_ref):

        def mm(x, w):
            # bf16 MXU matmul with f32 accumulation.  x:(M,K), w:(K,N) bf16.
            return lax.dot_general(x.astype(BF16), w,
                                   dimension_numbers=(((1,), (0,)), ((), ())),
                                   preferred_element_type=F32)

        def softmax_last(x):
            m = jnp.max(x, axis=-1, keepdims=True)
            e = jnp.exp(x - m)
            return e * pl.reciprocal(jnp.sum(e, axis=-1, keepdims=True), approx=True)

        def layernorm(z, g, b):
            mu = jnp.mean(z, axis=-1, keepdims=True)
            var = jnp.mean(jnp.square(z - mu), axis=-1, keepdims=True)
            return (z - mu) * lax.rsqrt(var + eps) * g + b

        # -------- gen_common_input: delta_y = (y - H @ E[x]) / sqrt(2*NT) --------
        xt_a = xt_ref[...]                                                # (BN, Q) f32
        probs = softmax_last(xt_a)
        x_real = jnp.sum(probs * rc_ref[...], axis=-1, keepdims=True)     # (BN, 1)
        x_imag = jnp.sum(probs * ic_ref[...], axis=-1, keepdims=True)     # (BN, 1)
        y_a = y_ref[...]                                                  # (B, 2NR)
        delta_rows = []
        for b in range(B):   # static unroll; ~2*NT*2NR MACs per batch -> stays on VPU
            ht_b = ht_ref[b]                                              # (2NT, 2NR)
            xr = x_real[b * NT:(b + 1) * NT, :]                           # (NT, 1)
            xi = x_imag[b * NT:(b + 1) * NT, :]
            hx = (jnp.sum(ht_b[:NT, :] * xr, axis=0, keepdims=True)
                  + jnp.sum(ht_b[NT:, :] * xi, axis=0, keepdims=True))    # (1, 2NR)
            d_b = (y_a[b:b + 1, :] - hx) * inv_sqrt
            delta_rows.append(jnp.broadcast_to(d_b, (NT, 2 * NR)))
        delta_s = jnp.concatenate(delta_rows, axis=0)                     # (BN, 2NR)

        # -------- encoder: multi-head self-attention (zero attn_mask dropped) --------
        src = st_ref[...]                                                 # (BN, D)
        qkv = mm(src, wqkv_ref[...]) + bqkv_ref[...]                      # (BN, 3D)
        attn_rows = []
        for b in range(B):
            r0 = b * NT
            acc = None
            for h in range(nhead):
                c = h * hd
                q = qkv[r0:r0 + NT, c:c + hd] * scale                     # (NT, hd)
                k = qkv[r0:r0 + NT, D + c:D + c + hd]
                v = qkv[r0:r0 + NT, 2 * D + c:2 * D + c + hd]
                s = lax.dot_general(q.astype(BF16), k.astype(BF16),
                                    dimension_numbers=(((1,), (1,)), ((), ())),
                                    preferred_element_type=F32)           # (NT, NT)
                pr = softmax_last(s)
                o = lax.dot_general(pr.astype(BF16), v.astype(BF16),
                                    dimension_numbers=(((1,), (0,)), ((), ())),
                                    preferred_element_type=F32)           # (NT, hd)
                # per-head out-projection block (avoids concatenating heads)
                oh = mm(o, wo_ref[h])                                     # (NT, D)
                acc = oh if acc is None else acc + oh
            attn_rows.append(acc)
        src2 = jnp.concatenate(attn_rows, axis=0) + bo_ref[...]           # (BN, D)
        src = layernorm(src + src2, ln1g_ref[...], ln1b_ref[...])

        # -------- encoder: concat-FFN, weights pre-split (no activation concat) --------
        ff = (mm(delta_s, wf1d_ref[...]) + mm(tgt_ref[...], wf1t_ref[...])
              + mm(xt_a, wf1x_ref[...]) + mm(src, wf1s_ref[...]) + bf1_ref[...])
        ff = jnp.maximum(ff, 0.0)
        src2 = mm(ff, wf2_ref[...]) + bf2_ref[...]
        enc = layernorm(src + src2, ln2g_ref[...], ln2b_ref[...])
        enc_ref[...] = enc.astype(enc_ref.dtype)

        # -------- decoder: 3-layer ReLU MLP, first layer with pre-split weights --------
        # TODO(synk): exact noise-feature preprocessing of the original decoder is
        # unavailable; raw noise_sigma broadcast to one feature column is used.
        d1 = (mm(delta_s, wd1d_ref[...]) + mm(tgt_ref[...], wd1t_ref[...])
              + mm(xt_a, wd1x_ref[...]) + mm(enc, wd1e_ref[...])
              + ns_ref[...] * wd1n_ref[...] + bd1_ref[...])
        d1 = jnp.maximum(d1, 0.0)
        d2 = jnp.maximum(mm(d1, wd2_ref[...]) + bd2_ref[...], 0.0)
        dec_ref[...] = (mm(d2, wd3_ref[...]) + bd3_ref[...]).astype(dec_ref.dtype)

    args = (st_s, xt_s, tgt_s, ht, y.astype(F32), ns_rows, p["rc"], p["ic"],
            p["w_qkv"], p["b_qkv"], p["w_o"], p["b_o"], p["ln1_g"], p["ln1_b"],
            p["w_f1_delta"], p["w_f1_tgt"], p["w_f1_xt"], p["w_f1_src"], p["b_f1"],
            p["w_f2"], p["b_f2"], p["ln2_g"], p["ln2_b"],
            p["w_d1_delta"], p["w_d1_tgt"], p["w_d1_xt"], p["w_d1_enc"],
            p["w_d1_noise"], p["b_d1"],
            p["w_d2"], p["b_d2"], p["w_d3"], p["b_d3"])

    enc2, dec2 = pl.pallas_call(
        kern,
        out_shape=(jax.ShapeDtypeStruct((BN, D), F32),
                   jax.ShapeDtypeStruct((BN, mod_n), F32)),
        in_specs=[pl.BlockSpec(memory_space=VMEM)] * len(args),
        out_specs=[pl.BlockSpec(memory_space=VMEM),
                   pl.BlockSpec(memory_space=VMEM)],
    )(*args)

    encoder_out = jnp.transpose(enc2.reshape(B, NT, D), (1, 0, 2))        # (NT, B, D)
    decoder_out = jnp.transpose(dec2.reshape(B, NT, mod_n), (1, 0, 2))    # (NT, B, Q)
    return encoder_out, decoder_out


# ----------------------------------------------------------------------------
# Parameter init (deterministic, PyTorch-like defaults), pre-laid-out for the kernel
# ----------------------------------------------------------------------------
def _linear_init(key, out_f, in_f):
    k1, k2 = jax.random.split(key)
    bound = 1.0 / math.sqrt(in_f)
    w = jax.random.uniform(k1, (out_f, in_f), F32, -bound, bound)
    b = jax.random.uniform(k2, (out_f,), F32, -bound, bound)
    return w, b


def _xavier_uniform(key, out_f, in_f):
    bound = math.sqrt(6.0 / (in_f + out_f))
    return jax.random.uniform(key, (out_f, in_f), F32, -bound, bound)


class EncoderDecoderBlockPallas:
    def __init__(self, d_model, nhead, NR, mod_n, real_QAM_const, imag_QAM_const,
                 constel, dim_feedforward=2048, dropout=0.1, seed=42):
        assert d_model % nhead == 0
        self.d_model, self.nhead, self.NR, self.mod_n = d_model, nhead, NR, mod_n
        self.dff = dim_feedforward
        self.constel = constel                       # unused in forward (as in reference)
        self.constel_size = int(math.isqrt(mod_n))
        hd = d_model // nhead

        enc_in_dim = 4 * NR + mod_n + d_model        # linear1 input: cat(encoder_input, src)
        dec_in_dim = 4 * NR + mod_n + d_model + 1    # cat(decoder_input, encoder_out, noise)

        key = jax.random.PRNGKey(seed)
        ks = jax.random.split(key, 12)
        # torch-layout (out, in) inits, then transposed once to (in, out), split at the
        # concat boundaries and cast to bf16 for the MXU (f32 accumulation in-kernel).
        in_proj_w = _xavier_uniform(ks[0], 3 * d_model, d_model)
        out_proj_w, _ = _linear_init(ks[1], d_model, d_model)
        ff_w1, ff_b1 = _linear_init(ks[2], dim_feedforward, enc_in_dim)
        ff_w2, ff_b2 = _linear_init(ks[3], d_model, dim_feedforward)
        dec_w1, dec_b1 = _linear_init(ks[4], d_model, dec_in_dim)
        dec_w2, dec_b2 = _linear_init(ks[5], d_model // 2, d_model)
        dec_w3, dec_b3 = _linear_init(ks[6], mod_n, d_model // 2)

        p = {}
        p["w_qkv"] = jnp.transpose(in_proj_w).astype(BF16)                        # (D, 3D)
        p["b_qkv"] = jnp.zeros((1, 3 * d_model), F32)
        p["w_o"] = jnp.transpose(out_proj_w).reshape(nhead, hd, d_model).astype(BF16)
        p["b_o"] = jnp.zeros((1, d_model), F32)
        p["ln1_g"] = jnp.ones((1, d_model), F32)
        p["ln1_b"] = jnp.zeros((1, d_model), F32)
        p["ln2_g"] = jnp.ones((1, d_model), F32)
        p["ln2_b"] = jnp.zeros((1, d_model), F32)
        w1t = jnp.transpose(ff_w1)                                                # (enc_in, dff)
        p["w_f1_delta"] = w1t[:2 * NR].astype(BF16)
        p["w_f1_tgt"] = w1t[2 * NR:4 * NR].astype(BF16)
        p["w_f1_xt"] = w1t[4 * NR:4 * NR + mod_n].astype(BF16)
        p["w_f1_src"] = w1t[4 * NR + mod_n:].astype(BF16)
        p["b_f1"] = ff_b1.reshape(1, dim_feedforward)
        p["w_f2"] = jnp.transpose(ff_w2).astype(BF16)                             # (dff, D)
        p["b_f2"] = ff_b2.reshape(1, d_model)
        wd1t = jnp.transpose(dec_w1)                                              # (dec_in, D)
        p["w_d1_delta"] = wd1t[:2 * NR].astype(BF16)
        p["w_d1_tgt"] = wd1t[2 * NR:4 * NR].astype(BF16)
        p["w_d1_xt"] = wd1t[4 * NR:4 * NR + mod_n].astype(BF16)
        p["w_d1_enc"] = wd1t[4 * NR + mod_n:4 * NR + mod_n + d_model].astype(BF16)
        p["w_d1_noise"] = wd1t[4 * NR + mod_n + d_model:].reshape(1, d_model)     # f32 scalar path
        p["b_d1"] = dec_b1.reshape(1, d_model)
        p["w_d2"] = jnp.transpose(dec_w2).astype(BF16)
        p["b_d2"] = dec_b2.reshape(1, d_model // 2)
        p["w_d3"] = jnp.transpose(dec_w3).astype(BF16)
        p["b_d3"] = dec_b3.reshape(1, mod_n)
        p["rc"] = jnp.asarray(real_QAM_const, F32).reshape(1, mod_n)
        p["ic"] = jnp.asarray(imag_QAM_const, F32).reshape(1, mod_n)
        # theta ~ N(1.0, 0.1): created as in the reference, not used in forward.
        p["theta"] = 1.0 + 0.1 * jax.random.normal(ks[7], (1,), F32)
        self.p = p

    def forward(self, st, xt, H, y, noise_sigma, NT, index, save_attn_weight=False):
        # dropout: eval-mode identity.  The all-zeros attn_mask of the reference is
        # dropped (softmax(s + 0) == softmax(s)).
        del NT, index, save_attn_weight
        return fused_forward(st, xt, H, y, noise_sigma, self.p,
                             nhead=self.nhead, NR=self.NR, mod_n=self.mod_n)


# ----------------------------------------------------------------------------
if __name__ == "__main__":
    B, NT, NR, mod_n = 2, 8, 4, 16
    d_model, nhead, dff = 32, 4, 64

    key = jax.random.PRNGKey(0)
    ks = jax.random.split(key, 5)
    st = jax.random.normal(ks[0], (NT, B, d_model), F32)
    xt = jax.random.normal(ks[1], (NT, B, mod_n), F32)
    H = jax.random.normal(ks[2], (B, 2 * NR, 2 * NT), F32) / math.sqrt(2 * NR)
    y = jax.random.normal(ks[3], (B, 2 * NR), F32)
    noise_sigma = jnp.abs(jax.random.normal(ks[4], (B,), F32)) * 0.1 + 0.05

    # QAM-16 constellation constants (normalized Gray-style grid).
    levels = np.array([-3.0, -1.0, 1.0, 3.0], np.float32) / math.sqrt(10.0)
    real_c = jnp.asarray(np.repeat(levels, 4), F32)   # (mod_n,)
    imag_c = jnp.asarray(np.tile(levels, 4), F32)     # (mod_n,)
    constel = real_c + 1j * imag_c

    model = EncoderDecoderBlockPallas(d_model, nhead, NR, mod_n, real_c, imag_c,
                                      constel, dim_feedforward=dff)

    encoder_out, decoder_out = model.forward(st, xt, H, y, noise_sigma, NT, index=0)
    jax.block_until_ready((encoder_out, decoder_out))

    assert encoder_out.shape == (NT, B, d_model)
    assert decoder_out.shape == (NT, B, mod_n)
    assert bool(jnp.all(jnp.isfinite(encoder_out))) and bool(jnp.all(jnp.isfinite(decoder_out)))
    print("KERNEL_OK")
</pallas_src>

<mosaic_0001>
module attributes {stable_mosaic.version = 11 : i64} {
  func.func @kern(%arg0: memref<16x32xf32, #tpu.memory_space<vmem>>, %arg1: memref<16x16xf32, #tpu.memory_space<vmem>>, %arg2: memref<16x8xf32, #tpu.memory_space<vmem>>, %arg3: memref<2x16x8xf32, #tpu.memory_space<vmem>>, %arg4: memref<2x8xf32, #tpu.memory_space<vmem>>, %arg5: memref<16x1xf32, #tpu.memory_space<vmem>>, %arg6: memref<1x16xf32, #tpu.memory_space<vmem>>, %arg7: memref<1x16xf32, #tpu.memory_space<vmem>>, %arg8: memref<32x96xbf16, #tpu.memory_space<vmem>>, %arg9: memref<1x96xf32, #tpu.memory_space<vmem>>, %arg10: memref<4x8x32xbf16, #tpu.memory_space<vmem>>, %arg11: memref<1x32xf32, #tpu.memory_space<vmem>>, %arg12: memref<1x32xf32, #tpu.memory_space<vmem>>, %arg13: memref<1x32xf32, #tpu.memory_space<vmem>>, %arg14: memref<8x64xbf16, #tpu.memory_space<vmem>>, %arg15: memref<8x64xbf16, #tpu.memory_space<vmem>>, %arg16: memref<16x64xbf16, #tpu.memory_space<vmem>>, %arg17: memref<32x64xbf16, #tpu.memory_space<vmem>>, %arg18: memref<1x64xf32, #tpu.memory_space<vmem>>, %arg19: memref<64x32xbf16, #tpu.memory_space<vmem>>, %arg20: memref<1x32xf32, #tpu.memory_space<vmem>>, %arg21: memref<1x32xf32, #tpu.memory_space<vmem>>, %arg22: memref<1x32xf32, #tpu.memory_space<vmem>>, %arg23: memref<8x32xbf16, #tpu.memory_space<vmem>>, %arg24: memref<8x32xbf16, #tpu.memory_space<vmem>>, %arg25: memref<16x32xbf16, #tpu.memory_space<vmem>>, %arg26: memref<32x32xbf16, #tpu.memory_space<vmem>>, %arg27: memref<1x32xf32, #tpu.memory_space<vmem>>, %arg28: memref<1x32xf32, #tpu.memory_space<vmem>>, %arg29: memref<32x16xbf16, #tpu.memory_space<vmem>>, %arg30: memref<1x16xf32, #tpu.memory_space<vmem>>, %arg31: memref<16x16xbf16, #tpu.memory_space<vmem>>, %arg32: memref<1x16xf32, #tpu.memory_space<vmem>>, %arg33: memref<16x32xf32, #tpu.memory_space<vmem>>, %arg34: memref<16x16xf32, #tpu.memory_space<vmem>>) attributes {dimension_semantics = [], scalar_prefetch = 0 : i64, scratch_operands = 0 : i64, tpu.core_type = #tpu.core_type<tc>} {
    %c0 = arith.constant 0 : index
    %c0_0 = arith.constant 0 : index
    %0 = vector.load %arg1[%c0, %c0_0] : memref<16x16xf32, #tpu.memory_space<vmem>>, vector<16x16xf32>
    %cst = arith.constant dense<0xFF800000> : vector<16xf32>
    %1 = vector.multi_reduction <maximumf>, %0, %cst [1] : vector<16x16xf32> to vector<16xf32>
    %2 = vector.shape_cast %1 : vector<16xf32> to vector<16x1xf32>
    %3 = vector.broadcast %2 : vector<16x1xf32> to vector<16x16xf32>
    %4 = arith.subf %0, %3 : vector<16x16xf32>
    %5 = math.exp %4 : vector<16x16xf32>
    %cst_1 = arith.constant dense<0.000000e+00> : vector<16xf32>
    %6 = vector.multi_reduction <add>, %5, %cst_1 [1] : vector<16x16xf32> to vector<16xf32>
    %7 = vector.shape_cast %6 : vector<16xf32> to vector<16x1xf32>
    %8 = tpu.reciprocal %7 {approx = true} : vector<16x1xf32> -> vector<16x1xf32>
    %9 = vector.broadcast %8 : vector<16x1xf32> to vector<16x16xf32>
    %10 = arith.mulf %5, %9 : vector<16x16xf32>
    %c0_2 = arith.constant 0 : index
    %c0_3 = arith.constant 0 : index
    %11 = vector.load %arg6[%c0_2, %c0_3] : memref<1x16xf32, #tpu.memory_space<vmem>>, vector<1x16xf32>
    %12 = vector.broadcast %11 : vector<1x16xf32> to vector<16x16xf32>
    %13 = arith.mulf %10, %12 : vector<16x16xf32>
    %cst_4 = arith.constant dense<0.000000e+00> : vector<16xf32>
    %14 = vector.multi_reduction <add>, %13, %cst_4 [1] : vector<16x16xf32> to vector<16xf32>
    %15 = vector.shape_cast %14 : vector<16xf32> to vector<16x1xf32>
    %c0_5 = arith.constant 0 : index
    %c0_6 = arith.constant 0 : index
    %16 = vector.load %arg7[%c0_5, %c0_6] : memref<1x16xf32, #tpu.memory_space<vmem>>, vector<1x16xf32>
    %17 = vector.broadcast %16 : vector<1x16xf32> to vector<16x16xf32>
    %18 = arith.mulf %10, %17 : vector<16x16xf32>
    %cst_7 = arith.constant dense<0.000000e+00> : vector<16xf32>
    %19 = vector.multi_reduction <add>, %18, %cst_7 [1] : vector<16x16xf32> to vector<16xf32>
    %20 = vector.shape_cast %19 : vector<16xf32> to vector<16x1xf32>
    %c0_8 = arith.constant 0 : index
    %c0_9 = arith.constant 0 : index
    %21 = vector.load %arg4[%c0_8, %c0_9] : memref<2x8xf32, #tpu.memory_space<vmem>>, vector<2x8xf32>
    %c0_10 = arith.constant 0 : index
    %c0_11 = arith.constant 0 : index
    %c0_12 = arith.constant 0 : index
    %22 = vector.load %arg3[%c0_10, %c0_11, %c0_12] : memref<2x16x8xf32, #tpu.memory_space<vmem>>, vector<1x16x8xf32>
    %23 = vector.shape_cast %22 : vector<1x16x8xf32> to vector<16x8xf32>
    %24 = vector.extract_strided_slice %15 {offsets = [0, 0], sizes = [8, 1], strides = [1, 1]} : vector<16x1xf32> to vector<8x1xf32>
    %25 = vector.extract_strided_slice %20 {offsets = [0, 0], sizes = [8, 1], strides = [1, 1]} : vector<16x1xf32> to vector<8x1xf32>
    %26 = vector.extract_strided_slice %23 {offsets = [0, 0], sizes = [8, 8], strides = [1, 1]} : vector<16x8xf32> to vector<8x8xf32>
    %27 = vector.broadcast %24 : vector<8x1xf32> to vector<8x8xf32>
    %28 = arith.mulf %26, %27 : vector<8x8xf32>
    %cst_13 = arith.constant dense<0.000000e+00> : vector<8xf32>
    %29 = vector.multi_reduction <add>, %28, %cst_13 [0] : vector<8x8xf32> to vector<8xf32>
    %30 = vector.shape_cast %29 : vector<8xf32> to vector<1x8xf32>
    %31 = vector.extract_strided_slice %23 {offsets = [8, 0], sizes = [8, 8], strides = [1, 1]} : vector<16x8xf32> to vector<8x8xf32>
    %32 = vector.broadcast %25 : vector<8x1xf32> to vector<8x8xf32>
    %33 = arith.mulf %31, %32 : vector<8x8xf32>
    %cst_14 = arith.constant dense<0.000000e+00> : vector<8xf32>
    %34 = vector.multi_reduction <add>, %33, %cst_14 [0] : vector<8x8xf32> to vector<8xf32>
    %35 = vector.shape_cast %34 : vector<8xf32> to vector<1x8xf32>
    %36 = arith.addf %30, %35 : vector<1x8xf32>
    %37 = vector.extract_strided_slice %21 {offsets = [0, 0], sizes = [1, 8], strides = [1, 1]} : vector<2x8xf32> to vector<1x8xf32>
    %38 = arith.subf %37, %36 : vector<1x8xf32>
    %cst_15 = arith.constant 2.500000e-01 : f32
    %39 = vector.broadcast %cst_15 : f32 to vector<1x8xf32>
    %40 = arith.mulf %38, %39 : vector<1x8xf32>
    %41 = vector.shape_cast %40 : vector<1x8xf32> to vector<1x8xf32>
    %42 = vector.broadcast %41 : vector<1x8xf32> to vector<8x8xf32>
    %c1 = arith.constant 1 : index
    %c0_16 = arith.constant 0 : index
    %c0_17 = arith.constant 0 : index
    %43 = vector.load %arg3[%c1, %c0_16, %c0_17] : memref<2x16x8xf32, #tpu.memory_space<vmem>>, vector<1x16x8xf32>
    %44 = vector.shape_cast %43 : vector<1x16x8xf32> to vector<16x8xf32>
    %45 = vector.extract_strided_slice %15 {offsets = [8, 0], sizes = [8, 1], strides = [1, 1]} : vector<16x1xf32> to vector<8x1xf32>
    %46 = vector.extract_strided_slice %20 {offsets = [8, 0], sizes = [8, 1], strides = [1, 1]} : vector<16x1xf32> to vector<8x1xf32>
    %47 = vector.extract_strided_slice %44 {offsets = [0, 0], sizes = [8, 8], strides = [1, 1]} : vector<16x8xf32> to vector<8x8xf32>
    %48 = vector.broadcast %45 : vector<8x1xf32> to vector<8x8xf32>
    %49 = arith.mulf %47, %48 : vector<8x8xf32>
    %cst_18 = arith.constant dense<0.000000e+00> : vector<8xf32>
    %50 = vector.multi_reduction <add>, %49, %cst_18 [0] : vector<8x8xf32> to vector<8xf32>
    %51 = vector.shape_cast %50 : vector<8xf32> to vector<1x8xf32>
    %52 = vector.extract_strided_slice %44 {offsets = [8, 0], sizes = [8, 8], strides = [1, 1]} : vector<16x8xf32> to vector<8x8xf32>
    %53 = vector.broadcast %46 : vector<8x1xf32> to vector<8x8xf32>
    %54 = arith.mulf %52, %53 : vector<8x8xf32>
    %cst_19 = arith.constant dense<0.000000e+00> : vector<8xf32>
    %55 = vector.multi_reduction <add>, %54, %cst_19 [0] : vector<8x8xf32> to vector<8xf32>
    %56 = vector.shape_cast %55 : vector<8xf32> to vector<1x8xf32>
    %57 = arith.addf %51, %56 : vector<1x8xf32>
    %58 = vector.extract_strided_slice %21 {offsets = [1, 0], sizes = [1, 8], strides = [1, 1]} : vector<2x8xf32> to vector<1x8xf32>
    %59 = arith.subf %58, %57 : vector<1x8xf32>
    %cst_20 = arith.constant 2.500000e-01 : f32
    %60 = vector.broadcast %cst_20 : f32 to vector<1x8xf32>
    %61 = arith.mulf %59, %60 : vector<1x8xf32>
    %62 = vector.shape_cast %61 : vector<1x8xf32> to vector<1x8xf32>
    %63 = vector.broadcast %62 : vector<1x8xf32> to vector<8x8xf32>
    %64 = tpu.concatenate %42, %63 in 0 : vector<8x8xf32>, vector<8x8xf32> -> vector<16x8xf32>
    %c0_21 = arith.constant 0 : index
    %c0_22 = arith.constant 0 : index
    %65 = vector.load %arg0[%c0_21, %c0_22] : memref<16x32xf32, #tpu.memory_space<vmem>>, vector<16x32xf32>
    %c0_23 = arith.constant 0 : index
    %c0_24 = arith.constant 0 : index
    %66 = vector.load %arg8[%c0_23, %c0_24] : memref<32x96xbf16, #tpu.memory_space<vmem>>, vector<32x96xbf16>
    %67 = arith.truncf %65 : vector<16x32xf32> to vector<16x32xbf16>
    %cst_25 = arith.constant dense<0.000000e+00> : vector<16x96xf32>
    %68 = tpu.matmul %67, %66, %cst_25 {dimension_numbers = #tpu.dot_dimension_numbers<[1], [0], [0], [1], [0, 0, 1, 1], [], []>} : vector<16x32xbf16>, vector<32x96xbf16>, vector<16x96xf32> -> vector<16x96xf32>
    %c0_26 = arith.constant 0 : index
    %c0_27 = arith.constant 0 : index
    %69 = vector.load %arg9[%c0_26, %c0_27] : memref<1x96xf32, #tpu.memory_space<vmem>>, vector<1x96xf32>
    %70 = vector.broadcast %69 : vector<1x96xf32> to vector<16x96xf32>
    %71 = arith.addf %68, %70 : vector<16x96xf32>
    %72 = vector.extract_strided_slice %71 {offsets = [0, 0], sizes = [8, 8], strides = [1, 1]} : vector<16x96xf32> to vector<8x8xf32>
    %cst_28 = arith.constant 0.353553385 : f32
    %73 = vector.broadcast %cst_28 : f32 to vector<8x8xf32>
    %74 = arith.mulf %72, %73 : vector<8x8xf32>
    %75 = vector.extract_strided_slice %71 {offsets = [0, 32], sizes = [8, 8], strides = [1, 1]} : vector<16x96xf32> to vector<8x8xf32>
    %76 = vector.extract_strided_slice %71 {offsets = [0, 64], sizes = [8, 8], strides = [1, 1]} : vector<16x96xf32> to vector<8x8xf32>
    %77 = arith.truncf %74 : vector<8x8xf32> to vector<8x8xbf16>
    %78 = arith.truncf %75 : vector<8x8xf32> to vector<8x8xbf16>
    %cst_29 = arith.constant dense<0.000000e+00> : vector<8x8xf32>
    %79 = tpu.matmul %77, %78, %cst_29 {dimension_numbers = #tpu.dot_dimension_numbers<[1], [1], [0], [0], [0, 0, 1, 0], [], []>} : vector<8x8xbf16>, vector<8x8xbf16>, vector<8x8xf32> -> vector<8x8xf32>
    %cst_30 = arith.constant dense<0xFF800000> : vector<8xf32>
    %80 = vector.multi_reduction <maximumf>, %79, %cst_30 [1] : vector<8x8xf32> to vector<8xf32>
    %81 = vector.shape_cast %80 : vector<8xf32> to vector<8x1xf32>
    %82 = vector.broadcast %81 : vector<8x1xf32> to vector<8x8xf32>
    %83 = arith.subf %79, %82 : vector<8x8xf32>
    %84 = math.exp %83 : vector<8x8xf32>
    %cst_31 = arith.constant dense<0.000000e+00> : vector<8xf32>
    %85 = vector.multi_reduction <add>, %84, %cst_31 [1] : vector<8x8xf32> to vector<8xf32>
    %86 = vector.shape_cast %85 : vector<8xf32> to vector<8x1xf32>
    %87 = tpu.reciprocal %86 {approx = true} : vector<8x1xf32> -> vector<8x1xf32>
    %88 = vector.broadcast %87 : vector<8x1xf32> to vector<8x8xf32>
    %89 = arith.mulf %84, %88 : vector<8x8xf32>
    %90 = arith.truncf %89 : vector<8x8xf32> to vector<8x8xbf16>
    %91 = arith.truncf %76 : vector<8x8xf32> to vector<8x8xbf16>
    %cst_32 = arith.constant dense<0.000000e+00> : vector<8x8xf32>
    %92 = tpu.matmul %90, %91, %cst_32 {dimension_numbers = #tpu.dot_dimension_numbers<[1], [0], [0], [1], [0, 0, 1, 1], [], []>} : vector<8x8xbf16>, vector<8x8xbf16>, vector<8x8xf32> -> vector<8x8xf32>
    %c0_33 = arith.constant 0 : index
    %c0_34 = arith.constant 0 : index
    %c0_35 = arith.constant 0 : index
    %93 = vector.load %arg10[%c0_33, %c0_34, %c0_35] : memref<4x8x32xbf16, #tpu.memory_space<vmem>>, vector<1x8x32xbf16>
    %94 = vector.shape_cast %93 : vector<1x8x32xbf16> to vector<8x32xbf16>
    %95 = arith.truncf %92 : vector<8x8xf32> to vector<8x8xbf16>
    %cst_36 = arith.constant dense<0.000000e+00> : vector<8x32xf32>
    %96 = tpu.matmul %95, %94, %cst_36 {dimension_numbers = #tpu.dot_dimension_numbers<[1], [0], [0], [1], [0, 0, 1, 1], [], []>} : vector<8x8xbf16>, vector<8x32xbf16>, vector<8x32xf32> -> vector<8x32xf32>
    %97 = vector.extract_strided_slice %71 {offsets = [0, 8], sizes = [8, 8], strides = [1, 1]} : vector<16x96xf32> to vector<8x8xf32>
    %cst_37 = arith.constant 0.353553385 : f32
    %98 = vector.broadcast %cst_37 : f32 to vector<8x8xf32>
    %99 = arith.mulf %97, %98 : vector<8x8xf32>
    %100 = vector.extract_strided_slice %71 {offsets = [0, 40], sizes = [8, 8], strides = [1, 1]} : vector<16x96xf32> to vector<8x8xf32>
    %101 = vector.extract_strided_slice %71 {offsets = [0, 72], sizes = [8, 8], strides = [1, 1]} : vector<16x96xf32> to vector<8x8xf32>
    %102 = arith.truncf %99 : vector<8x8xf32> to vector<8x8xbf16>
    %103 = arith.truncf %100 : vector<8x8xf32> to vector<8x8xbf16>
    %cst_38 = arith.constant dense<0.000000e+00> : vector<8x8xf32>
    %104 = tpu.matmul %102, %103, %cst_38 {dimension_numbers = #tpu.dot_dimension_numbers<[1], [1], [0], [0], [0, 0, 1, 0], [], []>} : vector<8x8xbf16>, vector<8x8xbf16>, vector<8x8xf32> -> vector<8x8xf32>
    %cst_39 = arith.constant dense<0xFF800000> : vector<8xf32>
    %105 = vector.multi_reduction <maximumf>, %104, %cst_39 [1] : vector<8x8xf32> to vector<8xf32>
    %106 = vector.shape_cast %105 : vector<8xf32> to vector<8x1xf32>
    %107 = vector.broadcast %106 : vector<8x1xf32> to vector<8x8xf32>
    %108 = arith.subf %104, %107 : vector<8x8xf32>
    %109 = math.exp %108 : vector<8x8xf32>
    %cst_40 = arith.constant dense<0.000000e+00> : vector<8xf32>
    %110 = vector.multi_reduction <add>, %109, %cst_40 [1] : vector<8x8xf32> to vector<8xf32>
    %111 = vector.shape_cast %110 : vector<8xf32> to vector<8x1xf32>
    %112 = tpu.reciprocal %111 {approx = true} : vector<8x1xf32> -> vector<8x1xf32>
    %113 = vector.broadcast %112 : vector<8x1xf32> to vector<8x8xf32>
    %114 = arith.mulf %109, %113 : vector<8x8xf32>
    %115 = arith.truncf %114 : vector<8x8xf32> to vector<8x8xbf16>
    %116 = arith.truncf %101 : vector<8x8xf32> to vector<8x8xbf16>
    %cst_41 = arith.constant dense<0.000000e+00> : vector<8x8xf32>
    %117 = tpu.matmul %115, %116, %cst_41 {dimension_numbers = #tpu.dot_dimension_numbers<[1], [0], [0], [1], [0, 0, 1, 1], [], []>} : vector<8x8xbf16>, vector<8x8xbf16>, vector<8x8xf32> -> vector<8x8xf32>
    %c1_42 = arith.constant 1 : index
    %c0_43 = arith.constant 0 : index
    %c0_44 = arith.constant 0 : index
    %118 = vector.load %arg10[%c1_42, %c0_43, %c0_44] : memref<4x8x32xbf16, #tpu.memory_space<vmem>>, vector<1x8x32xbf16>
    %119 = vector.shape_cast %118 : vector<1x8x32xbf16> to vector<8x32xbf16>
    %120 = arith.truncf %117 : vector<8x8xf32> to vector<8x8xbf16>
    %cst_45 = arith.constant dense<0.000000e+00> : vector<8x32xf32>
    %121 = tpu.matmul %120, %119, %cst_45 {dimension_numbers = #tpu.dot_dimension_numbers<[1], [0], [0], [1], [0, 0, 1, 1], [], []>} : vector<8x8xbf16>, vector<8x32xbf16>, vector<8x32xf32> -> vector<8x32xf32>
    %122 = arith.addf %96, %121 : vector<8x32xf32>
    %123 = vector.extract_strided_slice %71 {offsets = [0, 16], sizes = [8, 8], strides = [1, 1]} : vector<16x96xf32> to vector<8x8xf32>
    %cst_46 = arith.constant 0.353553385 : f32
    %124 = vector.broadcast %cst_46 : f32 to vector<8x8xf32>
    %125 = arith.mulf %123, %124 : vector<8x8xf32>
    %126 = vector.extract_strided_slice %71 {offsets = [0, 48], sizes = [8, 8], strides = [1, 1]} : vector<16x96xf32> to vector<8x8xf32>
    %127 = vector.extract_strided_slice %71 {offsets = [0, 80], sizes = [8, 8], strides = [1, 1]} : vector<16x96xf32> to vector<8x8xf32>
    %128 = arith.truncf %125 : vector<8x8xf32> to vector<8x8xbf16>
    %129 = arith.truncf %126 : vector<8x8xf32> to vector<8x8xbf16>
    %cst_47 = arith.constant dense<0.000000e+00> : vector<8x8xf32>
    %130 = tpu.matmul %128, %129, %cst_47 {dimension_numbers = #tpu.dot_dimension_numbers<[1], [1], [0], [0], [0, 0, 1, 0], [], []>} : vector<8x8xbf16>, vector<8x8xbf16>, vector<8x8xf32> -> vector<8x8xf32>
    %cst_48 = arith.constant dense<0xFF800000> : vector<8xf32>
    %131 = vector.multi_reduction <maximumf>, %130, %cst_48 [1] : vector<8x8xf32> to vector<8xf32>
    %132 = vector.shape_cast %131 : vector<8xf32> to vector<8x1xf32>
    %133 = vector.broadcast %132 : vector<8x1xf32> to vector<8x8xf32>
    %134 = arith.subf %130, %133 : vector<8x8xf32>
    %135 = math.exp %134 : vector<8x8xf32>
    %cst_49 = arith.constant dense<0.000000e+00> : vector<8xf32>
    %136 = vector.multi_reduction <add>, %135, %cst_49 [1] : vector<8x8xf32> to vector<8xf32>
    %137 = vector.shape_cast %136 : vector<8xf32> to vector<8x1xf32>
    %138 = tpu.reciprocal %137 {approx = true} : vector<8x1xf32> -> vector<8x1xf32>
    %139 = vector.broadcast %138 : vector<8x1xf32> to vector<8x8xf32>
    %140 = arith.mulf %135, %139 : vector<8x8xf32>
    %141 = arith.truncf %140 : vector<8x8xf32> to vector<8x8xbf16>
    %142 = arith.truncf %127 : vector<8x8xf32> to vector<8x8xbf16>
    %cst_50 = arith.constant dense<0.000000e+00> : vector<8x8xf32>
    %143 = tpu.matmul %141, %142, %cst_50 {dimension_numbers = #tpu.dot_dimension_numbers<[1], [0], [0], [1], [0, 0, 1, 1], [], []>} : vector<8x8xbf16>, vector<8x8xbf16>, vector<8x8xf32> -> vector<8x8xf32>
    %c2 = arith.constant 2 : index
    %c0_51 = arith.constant 0 : index
    %c0_52 = arith.constant 0 : index
    %144 = vector.load %arg10[%c2, %c0_51, %c0_52] : memref<4x8x32xbf16, #tpu.memory_space<vmem>>, vector<1x8x32xbf16>
    %145 = vector.shape_cast %144 : vector<1x8x32xbf16> to vector<8x32xbf16>
    %146 = arith.truncf %143 : vector<8x8xf32> to vector<8x8xbf16>
    %cst_53 = arith.constant dense<0.000000e+00> : vector<8x32xf32>
    %147 = tpu.matmul %146, %145, %cst_53 {dimension_numbers = #tpu.dot_dimension_numbers<[1], [0], [0], [1], [0, 0, 1, 1], [], []>} : vector<8x8xbf16>, vector<8x32xbf16>, vector<8x32xf32> -> vector<8x32xf32>
    %148 = arith.addf %122, %147 : vector<8x32xf32>
    %149 = vector.extract_strided_slice %71 {offsets = [0, 24], sizes = [8, 8], strides = [1, 1]} : vector<16x96xf32> to vector<8x8xf32>
    %cst_54 = arith.constant 0.353553385 : f32
    %150 = vector.broadcast %cst_54 : f32 to vector<8x8xf32>
    %151 = arith.mulf %149, %150 : vector<8x8xf32>
    %152 = vector.extract_strided_slice %71 {offsets = [0, 56], sizes = [8, 8], strides = [1, 1]} : vector<16x96xf32> to vector<8x8xf32>
    %153 = vector.extract_strided_slice %71 {offsets = [0, 88], sizes = [8, 8], strides = [1, 1]} : vector<16x96xf32> to vector<8x8xf32>
    %154 = arith.truncf %151 : vector<8x8xf32> to vector<8x8xbf16>
    %155 = arith.truncf %152 : vector<8x8xf32> to vector<8x8xbf16>
    %cst_55 = arith.constant dense<0.000000e+00> : vector<8x8xf32>
    %156 = tpu.matmul %154, %155, %cst_55 {dimension_numbers = #tpu.dot_dimension_numbers<[1], [1], [0], [0], [0, 0, 1, 0], [], []>} : vector<8x8xbf16>, vector<8x8xbf16>, vector<8x8xf32> -> vector<8x8xf32>
    %cst_56 = arith.constant dense<0xFF800000> : vector<8xf32>
    %157 = vector.multi_reduction <maximumf>, %156, %cst_56 [1] : vector<8x8xf32> to vector<8xf32>
    %158 = vector.shape_cast %157 : vector<8xf32> to vector<8x1xf32>
    %159 = vector.broadcast %158 : vector<8x1xf32> to vector<8x8xf32>
    %160 = arith.subf %156, %159 : vector<8x8xf32>
    %161 = math.exp %160 : vector<8x8xf32>
    %cst_57 = arith.constant dense<0.000000e+00> : vector<8xf32>
    %162 = vector.multi_reduction <add>, %161, %cst_57 [1] : vector<8x8xf32> to vector<8xf32>
    %163 = vector.shape_cast %162 : vector<8xf32> to vector<8x1xf32>
    %164 = tpu.reciprocal %163 {approx = true} : vector<8x1xf32> -> vector<8x1xf32>
    %165 = vector.broadcast %164 : vector<8x1xf32> to vector<8x8xf32>
    %166 = arith.mulf %161, %165 : vector<8x8xf32>
    %167 = arith.truncf %166 : vector<8x8xf32> to vector<8x8xbf16>
    %168 = arith.truncf %153 : vector<8x8xf32> to vector<8x8xbf16>
    %cst_58 = arith.constant dense<0.000000e+00> : vector<8x8xf32>
    %169 = tpu.matmul %167, %168, %cst_58 {dimension_numbers = #tpu.dot_dimension_numbers<[1], [0], [0], [1], [0, 0, 1, 1], [], []>} : vector<8x8xbf16>, vector<8x8xbf16>, vector<8x8xf32> -> vector<8x8xf32>
    %c3 = arith.constant 3 : index
    %c0_59 = arith.constant 0 : index
    %c0_60 = arith.constant 0 : index
    %170 = vector.load %arg10[%c3, %c0_59, %c0_60] : memref<4x8x32xbf16, #tpu.memory_space<vmem>>, vector<1x8x32xbf16>
    %171 = vector.shape_cast %170 : vector<1x8x32xbf16> to vector<8x32xbf16>
    %172 = arith.truncf %169 : vector<8x8xf32> to vector<8x8xbf16>
    %cst_61 = arith.constant dense<0.000000e+00> : vector<8x32xf32>
    %173 = tpu.matmul %172, %171, %cst_61 {dimension_numbers = #tpu.dot_dimension_numbers<[1], [0], [0], [1], [0, 0, 1, 1], [], []>} : vector<8x8xbf16>, vector<8x32xbf16>, vector<8x32xf32> -> vector<8x32xf32>
    %174 = arith.addf %148, %173 : vector<8x32xf32>
    %175 = vector.extract_strided_slice %71 {offsets = [8, 0], sizes = [8, 8], strides = [1, 1]} : vector<16x96xf32> to vector<8x8xf32>
    %cst_62 = arith.constant 0.353553385 : f32
    %176 = vector.broadcast %cst_62 : f32 to vector<8x8xf32>
    %177 = arith.mulf %175, %176 : vector<8x8xf32>
    %178 = vector.extract_strided_slice %71 {offsets = [8, 32], sizes = [8, 8], strides = [1, 1]} : vector<16x96xf32> to vector<8x8xf32>
    %179 = vector.extract_strided_slice %71 {offsets = [8, 64], sizes = [8, 8], strides = [1, 1]} : vector<16x96xf32> to vector<8x8xf32>
    %180 = arith.truncf %177 : vector<8x8xf32> to vector<8x8xbf16>
    %181 = arith.truncf %178 : vector<8x8xf32> to vector<8x8xbf16>
    %cst_63 = arith.constant dense<0.000000e+00> : vector<8x8xf32>
    %182 = tpu.matmul %180, %181, %cst_63 {dimension_numbers = #tpu.dot_dimension_numbers<[1], [1], [0], [0], [0, 0, 1, 0], [], []>} : vector<8x8xbf16>, vector<8x8xbf16>, vector<8x8xf32> -> vector<8x8xf32>
    %cst_64 = arith.constant dense<0xFF800000> : vector<8xf32>
    %183 = vector.multi_reduction <maximumf>, %182, %cst_64 [1] : vector<8x8xf32> to vector<8xf32>
    %184 = vector.shape_cast %183 : vector<8xf32> to vector<8x1xf32>
    %185 = vector.broadcast %184 : vector<8x1xf32> to vector<8x8xf32>
    %186 = arith.subf %182, %185 : vector<8x8xf32>
    %187 = math.exp %186 : vector<8x8xf32>
    %cst_65 = arith.constant dense<0.000000e+00> : vector<8xf32>
    %188 = vector.multi_reduction <add>, %187, %cst_65 [1] : vector<8x8xf32> to vector<8xf32>
    %189 = vector.shape_cast %188 : vector<8xf32> to vector<8x1xf32>
    %190 = tpu.reciprocal %189 {approx = true} : vector<8x1xf32> -> vector<8x1xf32>
    %191 = vector.broadcast %190 : vector<8x1xf32> to vector<8x8xf32>
    %192 = arith.mulf %187, %191 : vector<8x8xf32>
    %193 = arith.truncf %192 : vector<8x8xf32> to vector<8x8xbf16>
    %194 = arith.truncf %179 : vector<8x8xf32> to vector<8x8xbf16>
    %cst_66 = arith.constant dense<0.000000e+00> : vector<8x8xf32>
    %195 = tpu.matmul %193, %194, %cst_66 {dimension_numbers = #tpu.dot_dimension_numbers<[1], [0], [0], [1], [0, 0, 1, 1], [], []>} : vector<8x8xbf16>, vector<8x8xbf16>, vector<8x8xf32> -> vector<8x8xf32>
    %c0_67 = arith.constant 0 : index
    %c0_68 = arith.constant 0 : index
    %c0_69 = arith.constant 0 : index
    %196 = vector.load %arg10[%c0_67, %c0_68, %c0_69] : memref<4x8x32xbf16, #tpu.memory_space<vmem>>, vector<1x8x32xbf16>
    %197 = vector.shape_cast %196 : vector<1x8x32xbf16> to vector<8x32xbf16>
    %198 = arith.truncf %195 : vector<8x8xf32> to vector<8x8xbf16>
    %cst_70 = arith.constant dense<0.000000e+00> : vector<8x32xf32>
    %199 = tpu.matmul %198, %197, %cst_70 {dimension_numbers = #tpu.dot_dimension_numbers<[1], [0], [0], [1], [0, 0, 1, 1], [], []>} : vector<8x8xbf16>, vector<8x32xbf16>, vector<8x32xf32> -> vector<8x32xf32>
    %200 = vector.extract_strided_slice %71 {offsets = [8, 8], sizes = [8, 8], strides = [1, 1]} : vector<16x96xf32> to vector<8x8xf32>
    %cst_71 = arith.constant 0.353553385 : f32
    %201 = vector.broadcast %cst_71 : f32 to vector<8x8xf32>
    %202 = arith.mulf %200, %201 : vector<8x8xf32>
    %203 = vector.extract_strided_slice %71 {offsets = [8, 40], sizes = [8, 8], strides = [1, 1]} : vector<16x96xf32> to vector<8x8xf32>
    %204 = vector.extract_strided_slice %71 {offsets = [8, 72], sizes = [8, 8], strides = [1, 1]} : vector<16x96xf32> to vector<8x8xf32>
    %205 = arith.truncf %202 : vector<8x8xf32> to vector<8x8xbf16>
    %206 = arith.truncf %203 : vector<8x8xf32> to vector<8x8xbf16>
    %cst_72 = arith.constant dense<0.000000e+00> : vector<8x8xf32>
    %207 = tpu.matmul %205, %206, %cst_72 {dimension_numbers = #tpu.dot_dimension_numbers<[1], [1], [0], [0], [0, 0, 1, 0], [], []>} : vector<8x8xbf16>, vector<8x8xbf16>, vector<8x8xf32> -> vector<8x8xf32>
    %cst_73 = arith.constant dense<0xFF800000> : vector<8xf32>
    %208 = vector.multi_reduction <maximumf>, %207, %cst_73 [1] : vector<8x8xf32> to vector<8xf32>
    %209 = vector.shape_cast %208 : vector<8xf32> to vector<8x1xf32>
    %210 = vector.broadcast %209 : vector<8x1xf32> to vector<8x8xf32>
    %211 = arith.subf %207, %210 : vector<8x8xf32>
    %212 = math.exp %211 : vector<8x8xf32>
    %cst_74 = arith.constant dense<0.000000e+00> : vector<8xf32>
    %213 = vector.multi_reduction <add>, %212, %cst_74 [1] : vector<8x8xf32> to vector<8xf32>
    %214 = vector.shape_cast %213 : vector<8xf32> to vector<8x1xf32>
    %215 = tpu.reciprocal %214 {approx = true} : vector<8x1xf32> -> vector<8x1xf32>
    %216 = vector.broadcast %215 : vector<8x1xf32> to vector<8x8xf32>
    %217 = arith.mulf %212, %216 : vector<8x8xf32>
    %218 = arith.truncf %217 : vector<8x8xf32> to vector<8x8xbf16>
    %219 = arith.truncf %204 : vector<8x8xf32> to vector<8x8xbf16>
    %cst_75 = arith.constant dense<0.000000e+00> : vector<8x8xf32>
    %220 = tpu.matmul %218, %219, %cst_75 {dimension_numbers = #tpu.dot_dimension_numbers<[1], [0], [0], [1], [0, 0, 1, 1], [], []>} : vector<8x8xbf16>, vector<8x8xbf16>, vector<8x8xf32> -> vector<8x8xf32>
    %c1_76 = arith.constant 1 : index
    %c0_77 = arith.constant 0 : index
    %c0_78 = arith.constant 0 : index
    %221 = vector.load %arg10[%c1_76, %c0_77, %c0_78] : memref<4x8x32xbf16, #tpu.memory_space<vmem>>, vector<1x8x32xbf16>
    %222 = vector.shape_cast %221 : vector<1x8x32xbf16> to vector<8x32xbf16>
    %223 = arith.truncf %220 : vector<8x8xf32> to vector<8x8xbf16>
    %cst_79 = arith.constant dense<0.000000e+00> : vector<8x32xf32>
    %224 = tpu.matmul %223, %222, %cst_79 {dimension_numbers = #tpu.dot_dimension_numbers<[1], [0], [0], [1], [0, 0, 1, 1], [], []>} : vector<8x8xbf16>, vector<8x32xbf16>, vector<8x32xf32> -> vector<8x32xf32>
    %225 = arith.addf %199, %224 : vector<8x32xf32>
    %226 = vector.extract_strided_slice %71 {offsets = [8, 16], sizes = [8, 8], strides = [1, 1]} : vector<16x96xf32> to vector<8x8xf32>
    %cst_80 = arith.constant 0.353553385 : f32
    %227 = vector.broadcast %cst_80 : f32 to vector<8x8xf32>
    %228 = arith.mulf %226, %227 : vector<8x8xf32>
    %229 = vector.extract_strided_slice %71 {offsets = [8, 48], sizes = [8, 8], strides = [1, 1]} : vector<16x96xf32> to vector<8x8xf32>
    %230 = vector.extract_strided_slice %71 {offsets = [8, 80], sizes = [8, 8], strides = [1, 1]} : vector<16x96xf32> to vector<8x8xf32>
    %231 = arith.truncf %228 : vector<8x8xf32> to vector<8x8xbf16>
    %232 = arith.truncf %229 : vector<8x8xf32> to vector<8x8xbf16>
    %cst_81 = arith.constant dense<0.000000e+00> : vector<8x8xf32>
    %233 = tpu.matmul %231, %232, %cst_81 {dimension_numbers = #tpu.dot_dimension_numbers<[1], [1], [0], [0], [0, 0, 1, 0], [], []>} : vector<8x8xbf16>, vector<8x8xbf16>, vector<8x8xf32> -> vector<8x8xf32>
    %cst_82 = arith.constant dense<0xFF800000> : vector<8xf32>
    %234 = vector.multi_reduction <maximumf>, %233, %cst_82 [1] : vector<8x8xf32> to vector<8xf32>
    %235 = vector.shape_cast %234 : vector<8xf32> to vector<8x1xf32>
    %236 = vector.broadcast %235 : vector<8x1xf32> to vector<8x8xf32>
    %237 = arith.subf %233, %236 : vector<8x8xf32>
    %238 = math.exp %237 : vector<8x8xf32>
    %cst_83 = arith.constant dense<0.000000e+00> : vector<8xf32>
    %239 = vector.multi_reduction <add>, %238, %cst_83 [1] : vector<8x8xf32> to vector<8xf32>
    %240 = vector.shape_cast %239 : vector<8xf32> to vector<8x1xf32>
    %241 = tpu.reciprocal %240 {approx = true} : vector<8x1xf32> -> vector<8x1xf32>
    %242 = vector.broadcast %241 : vector<8x1xf32> to vector<8x8xf32>
    %243 = arith.mulf %238, %242 : vector<8x8xf32>
    %244 = arith.truncf %243 : vector<8x8xf32> to vector<8x8xbf16>
    %245 = arith.truncf %230 : vector<8x8xf32> to vector<8x8xbf16>
    %cst_84 = arith.constant dense<0.000000e+00> : vector<8x8xf32>
    %246 = tpu.matmul %244, %245, %cst_84 {dimension_numbers = #tpu.dot_dimension_numbers<[1], [0], [0], [1], [0, 0, 1, 1], [], []>} : vector<8x8xbf16>, vector<8x8xbf16>, vector<8x8xf32> -> vector<8x8xf32>
    %c2_85 = arith.constant 2 : index
    %c0_86 = arith.constant 0 : index
    %c0_87 = arith.constant 0 : index
    %247 = vector.load %arg10[%c2_85, %c0_86, %c0_87] : memref<4x8x32xbf16, #tpu.memory_space<vmem>>, vector<1x8x32xbf16>
    %248 = vector.shape_cast %247 : vector<1x8x32xbf16> to vector<8x32xbf16>
    %249 = arith.truncf %246 : vector<8x8xf32> to vector<8x8xbf16>
    %cst_88 = arith.constant dense<0.000000e+00> : vector<8x32xf32>
    %250 = tpu.matmul %249, %248, %cst_88 {dimension_numbers = #tpu.dot_dimension_numbers<[1], [0], [0], [1], [0, 0, 1, 1], [], []>} : vector<8x8xbf16>, vector<8x32xbf16>, vector<8x32xf32> -> vector<8x32xf32>
    %251 = arith.addf %225, %250 : vector<8x32xf32>
    %252 = vector.extract_strided_slice %71 {offsets = [8, 24], sizes = [8, 8], strides = [1, 1]} : vector<16x96xf32> to vector<8x8xf32>
    %cst_89 = arith.constant 0.353553385 : f32
    %253 = vector.broadcast %cst_89 : f32 to vector<8x8xf32>
    %254 = arith.mulf %252, %253 : vector<8x8xf32>
    %255 = vector.extract_strided_slice %71 {offsets = [8, 56], sizes = [8, 8], strides = [1, 1]} : vector<16x96xf32> to vector<8x8xf32>
    %256 = vector.extract_strided_slice %71 {offsets = [8, 88], sizes = [8, 8], strides = [1, 1]} : vector<16x96xf32> to vector<8x8xf32>
    %257 = arith.truncf %254 : vector<8x8xf32> to vector<8x8xbf16>
    %258 = arith.truncf %255 : vector<8x8xf32> to vector<8x8xbf16>
    %cst_90 = arith.constant dense<0.000000e+00> : vector<8x8xf32>
    %259 = tpu.matmul %257, %258, %cst_90 {dimension_numbers = #tpu.dot_dimension_numbers<[1], [1], [0], [0], [0, 0, 1, 0], [], []>} : vector<8x8xbf16>, vector<8x8xbf16>, vector<8x8xf32> -> vector<8x8xf32>
    %cst_91 = arith.constant dense<0xFF800000> : vector<8xf32>
    %260 = vector.multi_reduction <maximumf>, %259, %cst_91 [1] : vector<8x8xf32> to vector<8xf32>
    %261 = vector.shape_cast %260 : vector<8xf32> to vector<8x1xf32>
    %262 = vector.broadcast %261 : vector<8x1xf32> to vector<8x8xf32>
    %263 = arith.subf %259, %262 : vector<8x8xf32>
    %264 = math.exp %263 : vector<8x8xf32>
    %cst_92 = arith.constant dense<0.000000e+00> : vector<8xf32>
    %265 = vector.multi_reduction <add>, %264, %cst_92 [1] : vector<8x8xf32> to vector<8xf32>
    %266 = vector.shape_cast %265 : vector<8xf32> to vector<8x1xf32>
    %267 = tpu.reciprocal %266 {approx = true} : vector<8x1xf32> -> vector<8x1xf32>
    %268 = vector.broadcast %267 : vector<8x1xf32> to vector<8x8xf32>
    %269 = arith.mulf %264, %268 : vector<8x8xf32>
    %270 = arith.truncf %269 : vector<8x8xf32> to vector<8x8xbf16>
    %271 = arith.truncf %256 : vector<8x8xf32> to vector<8x8xbf16>
    %cst_93 = arith.constant dense<0.000000e+00> : vector<8x8xf32>
    %272 = tpu.matmul %270, %271, %cst_93 {dimension_numbers = #tpu.dot_dimension_numbers<[1], [0], [0], [1], [0, 0, 1, 1], [], []>} : vector<8x8xbf16>, vector<8x8xbf16>, vector<8x8xf32> -> vector<8x8xf32>
    %c3_94 = arith.constant 3 : index
    %c0_95 = arith.constant 0 : index
    %c0_96 = arith.constant 0 : index
    %273 = vector.load %arg10[%c3_94, %c0_95, %c0_96] : memref<4x8x32xbf16, #tpu.memory_space<vmem>>, vector<1x8x32xbf16>
    %274 = vector.shape_cast %273 : vector<1x8x32xbf16> to vector<8x32xbf16>
    %275 = arith.truncf %272 : vector<8x8xf32> to vector<8x8xbf16>
    %cst_97 = arith.constant dense<0.000000e+00> : vector<8x32xf32>
    %276 = tpu.matmul %275, %274, %cst_97 {dimension_numbers = #tpu.dot_dimension_numbers<[1], [0], [0], [1], [0, 0, 1, 1], [], []>} : vector<8x8xbf16>, vector<8x32xbf16>, vector<8x32xf32> -> vector<8x32xf32>
    %277 = arith.addf %251, %276 : vector<8x32xf32>
    %278 = tpu.concatenate %174, %277 in 0 : vector<8x32xf32>, vector<8x32xf32> -> vector<16x32xf32>
    %c0_98 = arith.constant 0 : index
    %c0_99 = arith.constant 0 : index
    %279 = vector.load %arg11[%c0_98, %c0_99] : memref<1x32xf32, #tpu.memory_space<vmem>>, vector<1x32xf32>
    %280 = vector.broadcast %279 : vector<1x32xf32> to vector<16x32xf32>
    %281 = arith.addf %278, %280 : vector<16x32xf32>
    %282 = arith.addf %65, %281 : vector<16x32xf32>
    %c0_100 = arith.constant 0 : index
    %c0_101 = arith.constant 0 : index
    %283 = vector.load %arg12[%c0_100, %c0_101] : memref<1x32xf32, #tpu.memory_space<vmem>>, vector<1x32xf32>
    %c0_102 = arith.constant 0 : index
    %c0_103 = arith.constant 0 : index
    %284 = vector.load %arg13[%c0_102, %c0_103] : memref<1x32xf32, #tpu.memory_space<vmem>>, vector<1x32xf32>
    %cst_104 = arith.constant dense<0.000000e+00> : vector<16xf32>
    %285 = vector.multi_reduction <add>, %282, %cst_104 [1] : vector<16x32xf32> to vector<16xf32>
    %286 = vector.shape_cast %285 : vector<16xf32> to vector<16x1xf32>
    %cst_105 = arith.constant 3.200000e+01 : f32
    %287 = vector.broadcast %cst_105 : f32 to vector<16x1xf32>
    %288 = arith.divf %286, %287 : vector<16x1xf32>
    %289 = vector.broadcast %288 : vector<16x1xf32> to vector<16x32xf32>
    %290 = arith.subf %282, %289 : vector<16x32xf32>
    %291 = arith.mulf %290, %290 : vector<16x32xf32>
    %cst_106 = arith.constant dense<0.000000e+00> : vector<16xf32>
    %292 = vector.multi_reduction <add>, %291, %cst_106 [1] : vector<16x32xf32> to vector<16xf32>
    %293 = vector.shape_cast %292 : vector<16xf32> to vector<16x1xf32>
    %cst_107 = arith.constant 3.200000e+01 : f32
    %294 = vector.broadcast %cst_107 : f32 to vector<16x1xf32>
    %295 = arith.divf %293, %294 : vector<16x1xf32>
    %296 = vector.broadcast %288 : vector<16x1xf32> to vector<16x32xf32>
    %297 = arith.subf %282, %296 : vector<16x32xf32>
    %cst_108 = arith.constant 9.99999974E-6 : f32
    %298 = vector.broadcast %cst_108 : f32 to vector<16x1xf32>
    %299 = arith.addf %295, %298 : vector<16x1xf32>
    %300 = math.rsqrt %299 : vector<16x1xf32>
    %301 = vector.broadcast %300 : vector<16x1xf32> to vector<16x32xf32>
    %302 = arith.mulf %297, %301 : vector<16x32xf32>
    %303 = vector.broadcast %283 : vector<1x32xf32> to vector<16x32xf32>
    %304 = arith.mulf %302, %303 : vector<16x32xf32>
    %305 = vector.broadcast %284 : vector<1x32xf32> to vector<16x32xf32>
    %306 = arith.addf %304, %305 : vector<16x32xf32>
    %c0_109 = arith.constant 0 : index
    %c0_110 = arith.constant 0 : index
    %307 = vector.load %arg14[%c0_109, %c0_110] : memref<8x64xbf16, #tpu.memory_space<vmem>>, vector<8x64xbf16>
    %308 = arith.truncf %64 : vector<16x8xf32> to vector<16x8xbf16>
    %cst_111 = arith.constant dense<0.000000e+00> : vector<16x64xf32>
    %309 = tpu.matmul %308, %307, %cst_111 {dimension_numbers = #tpu.dot_dimension_numbers<[1], [0], [0], [1], [0, 0, 1, 1], [], []>} : vector<16x8xbf16>, vector<8x64xbf16>, vector<16x64xf32> -> vector<16x64xf32>
    %c0_112 = arith.constant 0 : index
    %c0_113 = arith.constant 0 : index
    %310 = vector.load %arg2[%c0_112, %c0_113] : memref<16x8xf32, #tpu.memory_space<vmem>>, vector<16x8xf32>
    %c0_114 = arith.constant 0 : index
    %c0_115 = arith.constant 0 : index
    %311 = vector.load %arg15[%c0_114, %c0_115] : memref<8x64xbf16, #tpu.memory_space<vmem>>, vector<8x64xbf16>
    %312 = arith.truncf %310 : vector<16x8xf32> to vector<16x8xbf16>
    %cst_116 = arith.constant dense<0.000000e+00> : vector<16x64xf32>
    %313 = tpu.matmul %312, %311, %cst_116 {dimension_numbers = #tpu.dot_dimension_numbers<[1], [0], [0], [1], [0, 0, 1, 1], [], []>} : vector<16x8xbf16>, vector<8x64xbf16>, vector<16x64xf32> -> vector<16x64xf32>
    %314 = arith.addf %309, %313 : vector<16x64xf32>
    %c0_117 = arith.constant 0 : index
    %c0_118 = arith.constant 0 : index
    %315 = vector.load %arg16[%c0_117, %c0_118] : memref<16x64xbf16, #tpu.memory_space<vmem>>, vector<16x64xbf16>
    %316 = arith.truncf %0 : vector<16x16xf32> to vector<16x16xbf16>
    %cst_119 = arith.constant dense<0.000000e+00> : vector<16x64xf32>
    %317 = tpu.matmul %316, %315, %cst_119 {dimension_numbers = #tpu.dot_dimension_numbers<[1], [0], [0], [1], [0, 0, 1, 1], [], []>} : vector<16x16xbf16>, vector<16x64xbf16>, vector<16x64xf32> -> vector<16x64xf32>
    %318 = arith.addf %314, %317 : vector<16x64xf32>
    %c0_120 = arith.constant 0 : index
    %c0_121 = arith.constant 0 : index
    %319 = vector.load %arg17[%c0_120, %c0_121] : memref<32x64xbf16, #tpu.memory_space<vmem>>, vector<32x64xbf16>
    %320 = arith.truncf %306 : vector<16x32xf32> to vector<16x32xbf16>
    %cst_122 = arith.constant dense<0.000000e+00> : vector<16x64xf32>
    %321 = tpu.matmul %320, %319, %cst_122 {dimension_numbers = #tpu.dot_dimension_numbers<[1], [0], [0], [1], [0, 0, 1, 1], [], []>} : vector<16x32xbf16>, vector<32x64xbf16>, vector<16x64xf32> -> vector<16x64xf32>
    %322 = arith.addf %318, %321 : vector<16x64xf32>
    %c0_123 = arith.constant 0 : index
    %c0_124 = arith.constant 0 : index
    %323 = vector.load %arg18[%c0_123, %c0_124] : memref<1x64xf32, #tpu.memory_space<vmem>>, vector<1x64xf32>
    %324 = vector.broadcast %323 : vector<1x64xf32> to vector<16x64xf32>
    %325 = arith.addf %322, %324 : vector<16x64xf32>
    %cst_125 = arith.constant 0.000000e+00 : f32
    %326 = vector.broadcast %cst_125 : f32 to vector<16x64xf32>
    %327 = arith.maximumf %325, %326 : vector<16x64xf32>
    %c0_126 = arith.constant 0 : index
    %c0_127 = arith.constant 0 : index
    %328 = vector.load %arg19[%c0_126, %c0_127] : memref<64x32xbf16, #tpu.memory_space<vmem>>, vector<64x32xbf16>
    %329 = arith.truncf %327 : vector<16x64xf32> to vector<16x64xbf16>
    %cst_128 = arith.constant dense<0.000000e+00> : vector<16x32xf32>
    %330 = tpu.matmul %329, %328, %cst_128 {dimension_numbers = #tpu.dot_dimension_numbers<[1], [0], [0], [1], [0, 0, 1, 1], [], []>} : vector<16x64xbf16>, vector<64x32xbf16>, vector<16x32xf32> -> vector<16x32xf32>
    %c0_129 = arith.constant 0 : index
    %c0_130 = arith.constant 0 : index
    %331 = vector.load %arg20[%c0_129, %c0_130] : memref<1x32xf32, #tpu.memory_space<vmem>>, vector<1x32xf32>
    %332 = vector.broadcast %331 : vector<1x32xf32> to vector<16x32xf32>
    %333 = arith.addf %330, %332 : vector<16x32xf32>
    %334 = arith.addf %306, %333 : vector<16x32xf32>
    %c0_131 = arith.constant 0 : index
    %c0_132 = arith.constant 0 : index
    %335 = vector.load %arg21[%c0_131, %c0_132] : memref<1x32xf32, #tpu.memory_space<vmem>>, vector<1x32xf32>
    %c0_133 = arith.constant 0 : index
    %c0_134 = arith.constant 0 : index
    %336 = vector.load %arg22[%c0_133, %c0_134] : memref<1x32xf32, #tpu.memory_space<vmem>>, vector<1x32xf32>
    %cst_135 = arith.constant dense<0.000000e+00> : vector<16xf32>
    %337 = vector.multi_reduction <add>, %334, %cst_135 [1] : vector<16x32xf32> to vector<16xf32>
    %338 = vector.shape_cast %337 : vector<16xf32> to vector<16x1xf32>
    %cst_136 = arith.constant 3.200000e+01 : f32
    %339 = vector.broadcast %cst_136 : f32 to vector<16x1xf32>
    %340 = arith.divf %338, %339 : vector<16x1xf32>
    %341 = vector.broadcast %340 : vector<16x1xf32> to vector<16x32xf32>
    %342 = arith.subf %334, %341 : vector<16x32xf32>
    %343 = arith.mulf %342, %342 : vector<16x32xf32>
    %cst_137 = arith.constant dense<0.000000e+00> : vector<16xf32>
    %344 = vector.multi_reduction <add>, %343, %cst_137 [1] : vector<16x32xf32> to vector<16xf32>
    %345 = vector.shape_cast %344 : vector<16xf32> to vector<16x1xf32>
    %cst_138 = arith.constant 3.200000e+01 : f32
    %346 = vector.broadcast %cst_138 : f32 to vector<16x1xf32>
    %347 = arith.divf %345, %346 : vector<16x1xf32>
    %348 = vector.broadcast %340 : vector<16x1xf32> to vector<16x32xf32>
    %349 = arith.subf %334, %348 : vector<16x32xf32>
    %cst_139 = arith.constant 9.99999974E-6 : f32
    %350 = vector.broadcast %cst_139 : f32 to vector<16x1xf32>
    %351 = arith.addf %347, %350 : vector<16x1xf32>
    %352 = math.rsqrt %351 : vector<16x1xf32>
    %353 = vector.broadcast %352 : vector<16x1xf32> to vector<16x32xf32>
    %354 = arith.mulf %349, %353 : vector<16x32xf32>
    %355 = vector.broadcast %335 : vector<1x32xf32> to vector<16x32xf32>
    %356 = arith.mulf %354, %355 : vector<16x32xf32>
    %357 = vector.broadcast %336 : vector<1x32xf32> to vector<16x32xf32>
    %358 = arith.addf %356, %357 : vector<16x32xf32>
    %c0_140 = arith.constant 0 : index
    %c0_141 = arith.constant 0 : index
    %359 = vector.load %arg33[%c0_140, %c0_141] : memref<16x32xf32, #tpu.memory_space<vmem>>, vector<16x32xf32>
    tpu.vector_store %arg33[%c0_140, %c0_141], %358 {strides = array<i32>} : memref<16x32xf32, #tpu.memory_space<vmem>>, vector<16x32xf32>,
    %c0_142 = arith.constant 0 : index
    %c0_143 = arith.constant 0 : index
    %360 = vector.load %arg23[%c0_142, %c0_143] : memref<8x32xbf16, #tpu.memory_space<vmem>>, vector<8x32xbf16>
    %361 = arith.truncf %64 : vector<16x8xf32> to vector<16x8xbf16>
    %cst_144 = arith.constant dense<0.000000e+00> : vector<16x32xf32>
    %362 = tpu.matmul %361, %360, %cst_144 {dimension_numbers = #tpu.dot_dimension_numbers<[1], [0], [0], [1], [0, 0, 1, 1], [], []>} : vector<16x8xbf16>, vector<8x32xbf16>, vector<16x32xf32> -> vector<16x32xf32>
    %c0_145 = arith.constant 0 : index
    %c0_146 = arith.constant 0 : index
    %363 = vector.load %arg2[%c0_145, %c0_146] : memref<16x8xf32, #tpu.memory_space<vmem>>, vector<16x8xf32>
    %c0_147 = arith.constant 0 : index
    %c0_148 = arith.constant 0 : index
    %364 = vector.load %arg24[%c0_147, %c0_148] : memref<8x32xbf16, #tpu.memory_space<vmem>>, vector<8x32xbf16>
    %365 = arith.truncf %363 : vector<16x8xf32> to vector<16x8xbf16>
    %cst_149 = arith.constant dense<0.000000e+00> : vector<16x32xf32>
    %366 = tpu.matmul %365, %364, %cst_149 {dimension_numbers = #tpu.dot_dimension_numbers<[1], [0], [0], [1], [0, 0, 1, 1], [], []>} : vector<16x8xbf16>, vector<8x32xbf16>, vector<16x32xf32> -> vector<16x32xf32>
    %367 = arith.addf %362, %366 : vector<16x32xf32>
    %c0_150 = arith.constant 0 : index
    %c0_151 = arith.constant 0 : index
    %368 = vector.load %arg25[%c0_150, %c0_151] : memref<16x32xbf16, #tpu.memory_space<vmem>>, vector<16x32xbf16>
    %369 = arith.truncf %0 : vector<16x16xf32> to vector<16x16xbf16>
    %cst_152 = arith.constant dense<0.000000e+00> : vector<16x32xf32>
    %370 = tpu.matmul %369, %368, %cst_152 {dimension_numbers = #tpu.dot_dimension_numbers<[1], [0], [0], [1], [0, 0, 1, 1], [], []>} : vector<16x16xbf16>, vector<16x32xbf16>, vector<16x32xf32> -> vector<16x32xf32>
    %371 = arith.addf %367, %370 : vector<16x32xf32>
    %c0_153 = arith.constant 0 : index
    %c0_154 = arith.constant 0 : index
    %372 = vector.load %arg26[%c0_153, %c0_154] : memref<32x32xbf16, #tpu.memory_space<vmem>>, vector<32x32xbf16>
    %373 = arith.truncf %358 : vector<16x32xf32> to vector<16x32xbf16>
    %cst_155 = arith.constant dense<0.000000e+00> : vector<16x32xf32>
    %374 = tpu.matmul %373, %372, %cst_155 {dimension_numbers = #tpu.dot_dimension_numbers<[1], [0], [0], [1], [0, 0, 1, 1], [], []>} : vector<16x32xbf16>, vector<32x32xbf16>, vector<16x32xf32> -> vector<16x32xf32>
    %375 = arith.addf %371, %374 : vector<16x32xf32>
    %c0_156 = arith.constant 0 : index
    %c0_157 = arith.constant 0 : index
    %376 = vector.load %arg5[%c0_156, %c0_157] : memref<16x1xf32, #tpu.memory_space<vmem>>, vector<16x1xf32>
    %c0_158 = arith.constant 0 : index
    %c0_159 = arith.constant 0 : index
    %377 = vector.load %arg27[%c0_158, %c0_159] : memref<1x32xf32, #tpu.memory_space<vmem>>, vector<1x32xf32>
    %378 = vector.broadcast %376 : vector<16x1xf32> to vector<16x32xf32>
    %379 = vector.broadcast %377 : vector<1x32xf32> to vector<16x32xf32>
    %380 = arith.mulf %378, %379 : vector<16x32xf32>
    %381 = arith.addf %375, %380 : vector<16x32xf32>
    %c0_160 = arith.constant 0 : index
    %c0_161 = arith.constant 0 : index
    %382 = vector.load %arg28[%c0_160, %c0_161] : memref<1x32xf32, #tpu.memory_space<vmem>>, vector<1x32xf32>
    %383 = vector.broadcast %382 : vector<1x32xf32> to vector<16x32xf32>
    %384 = arith.addf %381, %383 : vector<16x32xf32>
    %cst_162 = arith.constant 0.000000e+00 : f32
    %385 = vector.broadcast %cst_162 : f32 to vector<16x32xf32>
    %386 = arith.maximumf %384, %385 : vector<16x32xf32>
    %c0_163 = arith.constant 0 : index
    %c0_164 = arith.constant 0 : index
    %387 = vector.load %arg29[%c0_163, %c0_164] : memref<32x16xbf16, #tpu.memory_space<vmem>>, vector<32x16xbf16>
    %388 = arith.truncf %386 : vector<16x32xf32> to vector<16x32xbf16>
    %cst_165 = arith.constant dense<0.000000e+00> : vector<16x16xf32>
    %389 = tpu.matmul %388, %387, %cst_165 {dimension_numbers = #tpu.dot_dimension_numbers<[1], [0], [0], [1], [0, 0, 1, 1], [], []>} : vector<16x32xbf16>, vector<32x16xbf16>, vector<16x16xf32> -> vector<16x16xf32>
    %c0_166 = arith.constant 0 : index
    %c0_167 = arith.constant 0 : index
    %390 = vector.load %arg30[%c0_166, %c0_167] : memref<1x16xf32, #tpu.memory_space<vmem>>, vector<1x16xf32>
    %391 = vector.broadcast %390 : vector<1x16xf32> to vector<16x16xf32>
    %392 = arith.addf %389, %391 : vector<16x16xf32>
    %cst_168 = arith.constant 0.000000e+00 : f32
    %393 = vector.broadcast %cst_168 : f32 to vector<16x16xf32>
    %394 = arith.maximumf %392, %393 : vector<16x16xf32>
    %c0_169 = arith.constant 0 : index
    %c0_170 = arith.constant 0 : index
    %395 = vector.load %arg31[%c0_169, %c0_170] : memref<16x16xbf16, #tpu.memory_space<vmem>>, vector<16x16xbf16>
    %396 = arith.truncf %394 : vector<16x16xf32> to vector<16x16xbf16>
    %cst_171 = arith.constant dense<0.000000e+00> : vector<16x16xf32>
    %397 = tpu.matmul %396, %395, %cst_171 {dimension_numbers = #tpu.dot_dimension_numbers<[1], [0], [0], [1], [0, 0, 1, 1], [], []>} : vector<16x16xbf16>, vector<16x16xbf16>, vector<16x16xf32> -> vector<16x16xf32>
    %c0_172 = arith.constant 0 : index
    %c0_173 = arith.constant 0 : index
    %398 = vector.load %arg32[%c0_172, %c0_173] : memref<1x16xf32, #tpu.memory_space<vmem>>, vector<1x16xf32>
    %399 = vector.broadcast %398 : vector<1x16xf32> to vector<16x16xf32>
    %400 = arith.addf %397, %399 : vector<16x16xf32>
    %c0_174 = arith.constant 0 : index
    %c0_175 = arith.constant 0 : index
    %401 = vector.load %arg34[%c0_174, %c0_175] : memref<16x16xf32, #tpu.memory_space<vmem>>, vector<16x16xf32>
    tpu.vector_store %arg34[%c0_174, %c0_175], %400 {strides = array<i32>} : memref<16x16xf32, #tpu.memory_space<vmem>>, vector<16x16xf32>,
    return
  }
}

</mosaic_0001>

<bundles_post_ra>
// kernel: tpu_custom_call.1
= control target key start
LH: loop header
LB: loop body
LE: loop exit
PB: predicated region body
PF: predicated region fallthrough
CT: control target
= control target key end

     0   :  { %s3027_s6 = smov 1   ;;  %s3028_s10 = smov 2   ;;  %s3678_s0 = inlined_call_operand.smem [shape: u32[35], index: -1, kind: input, shape index: {}] }
   0x1   :  { %s3088_s5 = sld [smem:[%s3678_s0]]   ;;  %s3029_s14 = smov 3  }
   0x2   :  { %s3093_s9 = sld [smem:[%s3678_s0 + %s3027_s6]]   ;;  %s3030_s18 = smov 4  }
   0x3   :  { %s3098_s13 = sld [smem:[%s3678_s0 + %s3028_s10]]   ;;  %s3031_s22 = smov 5  }
   0x4   :  { %s3103_s17 = sld [smem:[%s3678_s0 + %s3029_s14]]   ;;  %s3032_s26 = smov 6  }
   0x5   :  { %s3108_s21 = sld [smem:[%s3678_s0 + %s3030_s18]]   ;;  %s3033_s30 = smov 7  }
   0x6   :  { %s3113_s25 = sld [smem:[%s3678_s0 + %s3031_s22]]   ;;  %s3034_s4 = smov 8  }
   0x7   :  { %s3118_s29 = sld [smem:[%s3678_s0 + %s3032_s26]]   ;;  %s3035_s10 = smov 9  }
   0x8   :  { %s3123_s3 = sld [smem:[%s3678_s0 + %s3033_s30]]   ;;  %s3036_s15 = smov 10  }
   0x9   :  { %s3128_s8 = sld [smem:[%s3678_s0 + %s3034_s4]]   ;;  %s3037_s20 = smov 11  }
   0xa   :  { %s3133_s14 = sld [smem:[%s3678_s0 + %s3035_s10]]   ;;  %s3038_s26 = smov 12  }
   0xb   :  { %s3138_s19 = sld [smem:[%s3678_s0 + %s3036_s15]]   ;;  %s3039_s1 = smov 13  }
   0xc   :  { %3684 = sst [smem:[#allocation11_spill]] %s3113_s25  ;;  %s3040_s7 = smov 14  }
   0xd   :  { %s3143_s24 = sld [smem:[%s3678_s0 + %s3037_s20]]   ;;  %s3041_s15 = smov 15  }
   0xe   :  { %s3148_s30 = sld [smem:[%s3678_s0 + %s3038_s26]]   ;;  %s3042_s22 = smov 16  }
   0xf   :  { %s3153_s6 = sld [smem:[%s3678_s0 + %s3039_s1]]   ;;  %s3043_s28 = smov 17  }
  0x10   :  { %s3158_s12 = sld [smem:[%s3678_s0 + %s3040_s7]]   ;;  %s3044_s7 = smov 18  }
  0x11   :  { %s3163_s20 = sld [smem:[%s3678_s0 + %s3041_s15]]   ;;  %s3045_s15 = smov 19  }
  0x12   :  { %s3168_s27 = sld [smem:[%s3678_s0 + %s3042_s22]]   ;;  %s3046_s22 = smov 20  }
  0x13   :  { %s3173_s4 = sld [smem:[%s3678_s0 + %s3043_s28]]   ;;  %s3047_s28 = smov 21  }
  0x14   :  { %3685 = sst [smem:[#allocation12_spill]] %s3148_s30 }
  0x15   :  { %3686 = sst [smem:[#allocation13_spill]] %s3153_s6 }
  0x16   :  { %s3178_s25 = sld [smem:[%s3678_s0 + %s3044_s7]]   ;;  %s3048_s7 = smov 22  }
  0x17   :  { %s3183_s6 = sld [smem:[%s3678_s0 + %s3045_s15]]   ;;  %s3049_s15 = smov 23  }
  0x18   :  { %s3188_s30 = sld [smem:[%s3678_s0 + %s3046_s22]]   ;;  %s3050_s22 = smov 24  }
  0x19   :  { %3687 = sst [smem:[#allocation14_spill]] %s3173_s4 }
  0x1a   :  { %s3193_s4 = sld [smem:[%s3678_s0 + %s3047_s28]]   ;;  %s3051_s28 = smov 25  }
  0x1c   :  { %3688 = sst [smem:[#allocation15_spill]] %s3178_s25 }
  0x1d   :  { %3689 = sst [smem:[#allocation16_spill]] %s3183_s6 }
  0x1e   :  { %3690 = sst [smem:[#allocation17_spill]] %s3188_s30 }
  0x1f   :  { %s3198_s25 = sld [smem:[%s3678_s0 + %s3048_s7]]   ;;  %s3052_s7 = smov 26  }
  0x20   :  { %3691 = sst [smem:[#allocation18_spill]] %s3193_s4 }
  0x21   :  { %s3203_s6 = sld [smem:[%s3678_s0 + %s3049_s15]]   ;;  %s3053_s15 = smov 27  }
  0x22   :  { %s3208_s30 = sld [smem:[%s3678_s0 + %s3050_s22]]   ;;  %s3054_s22 = smov 28  }
  0x23   :  { %s3213_s4 = sld [smem:[%s3678_s0 + %s3051_s28]]   ;;  %s3055_s28 = smov 29  }
  0x25   :  { %3692 = sst [smem:[#allocation19_spill]] %s3198_s25 }
  0x26   :  { %s3218_s25 = sld [smem:[%s3678_s0 + %s3052_s7]]   ;;  %s3056_s7 = smov 30  }
  0x27   :  { %3693 = sst [smem:[#allocation20_spill]] %s3203_s6 }
  0x28   :  { %3694 = sst [smem:[#allocation21_spill]] %s3208_s30 }
  0x29   :  { %3695 = sst [smem:[#allocation22_spill]] %s3213_s4 }
  0x2a   :  { %s3223_s6 = sld [smem:[%s3678_s0 + %s3053_s15]]   ;;  %s3057_s15 = smov 31  }
  0x2b   :  { %s3228_s30 = sld [smem:[%s3678_s0 + %s3054_s22]]   ;;  %s3058_s22 = smov 32  }
  0x2c   :  { %3696 = sst [smem:[#allocation23_spill]] %s3218_s25 }
  0x2d   :  { %s3233_s4 = sld [smem:[%s3678_s0 + %s3055_s28]]   ;;  %s3059_s28 = smov 33  }
  0x2e   :  { %s3238_s25 = sld [smem:[%s3678_s0 + %s3056_s7]]   ;;  %s3060_s7 = smov 34  }
  0x30   :  { %3697 = sst [smem:[#allocation24_spill]] %s3223_s6 }
  0x31   :  { %3698 = sst [smem:[#allocation25_spill]] %s3228_s30 }
  0x32   :  { %s3243_s6 = sld [smem:[%s3678_s0 + %s3057_s15]]  }
  0x33   :  { %3699 = sst [smem:[#allocation26_spill]] %s3233_s4 }
  0x34   :  { %3700 = sst [smem:[#allocation27_spill]] %s3238_s25 }
  0x35   :  { %s3248_s30 = sld [smem:[%s3678_s0 + %s3058_s22]]  }
  0x36   :  { %s3253_s4 = sld [smem:[%s3678_s0 + %s3059_s28]]  }
  0x37   :  { %s3258_s25 = sld [smem:[%s3678_s0 + %s3060_s7]]  }
  0x38   :  { %75 = vsyncpa [#allocation3], 0 }
  0x39   :  { %76 = vsyncpa [#allocation4], 0 }
  0x3a   :  { %77 = vsyncpa [#allocation7], 0  ;;  %s3061_s15 = smov [#allocation2]   ;;  %s2955_s18 = scalar_lea.hbm %s3108_s21, 32 }
  0x3b   :  { %s92_s16 = sshll.u32 %s3061_s15, 4  ;;  %p2956_p0 = scmp.ne.s32.totalorder %s3108_s21, %s2955_s18  ;;  %s93_s16 = int_to_ptr.vmem [resolvable:$true] %s92_s16 }
  0x3c   :  { %p2959_p1 = scmp.lt.u32.totalorder %s2955_s18, %s3108_s21 }
  0x3e   :  { %p2961_p2 = pnand %p2959_p1, %p2956_p0 }
  0x40   :  { %2964 = shalt.err (!%p2961_p2)
}
  0x41   :  { %s2965_s22 = scalar_lea.vmem %s93_s16, 32  ;;  %p2970_p4 = scmp.lt.s32.totalorder %s93_s16, %s93_s16 }
  0x42   :  { %p2966_p3 = scmp.ne.s32.totalorder %s93_s16, %s2965_s22  ;;  %p2971_p5 = scmp.lt.s32.totalorder %s2965_s22, %s2965_s22 }
  0x44   :  { %p2972_p6 = por %p2971_p5, %p2970_p4 }
  0x46   :  { %p2973_p7 = pnand %p2972_p6, %p2966_p3 }
  0x48   :  { %2976 = shalt.err (!%p2973_p7)
}
  0x49   :  { %95 = dma.hbm_to_vmem [thread:$0]  %s3108_s21, 32, %s93_s16, [#allocation3]  }
  0x4a   :  { %3021 = dma.done.wait [#allocation3], 32  }
  0x4b   :  { %3022 = vsyncadd [#allocation3], 4294967264  ;;  %v3062_v0 = vmov 0.0   ;;  %vm3063_vm0 = vmmov 0   ;;  %v2892_v1 = vld [vmem:[%s3128_s8] sm:$0xff]   ;;  %v2893_v2 = vld [vmem:[%s3128_s8 + $0x8] sm:$0xff]  }
  0x4c   :  { %2607 = vmatprep.subr.bf16.mxu0 %v3062_v0  ;;  %2611 = vmatprep.mubr.msk.bf16.mxu0 %vm3063_vm0, %v3062_v0  ;;  %v3273_v3 = vld [vmem:[%s3088_s5] sm:$0xff]  ;;  %v3276_v4 = vld [vmem:[%s3088_s5 + $0x8] sm:$0xff]  ;;  %vm290_vm1 = vcmask 261120   ;;  %s3064_s0 = smov 96   ;;  %s3065_s5 = smov 120   ;;  %vm215_vm2 = vcmask 64512  }
  0x4d   :  { %2615 = vmatprep.subr.bf16.mxu1 %v3062_v0  ;;  %2617 = vmatprep.mubr.msk.bf16.mxu1 %vm3063_vm0, %v3062_v0  ;;  %v270_v5 = vpack.c.bf16 %v3276_v4, %v3273_v3  ;;  %v2462_v6 = vld [vmem:[%s3133_s14] ss:$0 sm:$0xff]  ;;  %s3066_s21 = smov 88   ;;  %s3067_s8 = smov 64   ;;  %vm404_vm3 = vcmask 1043456   ;;  %vm158_vm4 = vcmask 130048  }
  0x4e   :  { %2608 = vmatpush3.bf16.msra.mxu0 %v2892_v1  ;;  %s3068_s14 = smov 56   ;;  %s3069_s23 = smov 112   ;;  %v448_v53 = vld [vmem:[%s3138_s19] sm:$0xf]  ;;  %v2470_v55 = vld [vmem:[%s3138_s19 + $0x4] sm:$0xf] }
  0x4f   :  { %2609 = vmatprep.subr.bf16.mxu0 %v3062_v0  ;;  %s3070_s26 = smov 80   ;;  %v3333_v54 = vsel %vm404_vm3, %v448_v53, 0  ;;  %v3338_v56 = vsel %vm404_vm3, %v2470_v55, 0  ;;  %s3071_s28 = smov 72   ;;  %vm1922_vm5 = vcmask 523264  }
  0x50   :  { %s3072_s1 = smov 104   ;;  %s3073_s2 = smov 48  }
  0x51   :  { %s3074_s7 = smov 40   ;;  %s3711_s10 = sld [smem:[#allocation11_spill]] }
  0x52   :  { %2610 = vmatpush3.bf16.msra.mxu0 %v2893_v2  ;;  %s3712_s11 = sld [smem:[#allocation18_spill]]  ;;  %s3713_s15 = sld [smem:[#allocation19_spill]] }
  0x53   :  { %2621 = vmatprep.subr.bf16.mxu0 %v3062_v0  ;;  %s3714_s16 = sld [smem:[#allocation26_spill]]  ;;  %s3715_s18 = sld [smem:[#allocation24_spill]] }
  0x54   :  { %s3716_s22 = sld [smem:[#allocation25_spill]] }
  0x55   :  { %2612 = vmatmul.mubr.msk.bf16.vlgmr.msra.gmra.mrb[0].mxu0 %vm290_vm1, %v270_v5 }
  0x56   :  { %2623 = vmatprep.mubr.msk.bf16.mxu0 %vm3063_vm0, %v3062_v0 }
 0x128   :  { %v328_v7 = vpop.f32.mrb[0].mxu0 }
 0x129   :  { %v329_v8 = vadd.f32 %v2462_v6, %v328_v7  ;;  %v2613_v9 = vpop.f32.mrb[1].mxu0 }
 0x12a   :  { %v331_v10 = vpop.f32.mrb[2].mxu0 }
 0x12b   :  { %v335_v11 = vmul.f32 0.35355338, %v329_v8  ;;  %v3286_v12 = vpack.c.bf16 %v329_v8, %v329_v8  ;;  %v3288_v13 = vadd.f32 %v2462_v6, %v331_v10  ;;  %v2614_v14 = vpop.f32.mrb[3].mxu0 }
 0x12d   :  { %v3290_v15 = vpack.c.bf16 %v335_v11, %v335_v11  ;;  %339 = vrot.lane.b32.xlu0 %v3286_v12, %s3064_s0 }
 0x12f   :  { %451 = vrot.lane.b32.xlu1 %v3290_v15, %s3065_s5 }
 0x131   :  { %453 = vrot.lane.b32.xlu0 %v3286_v12, %s3066_s21 }
 0x19f   :  { %v340_v16 = vpop.permute.xlu0 %339 }
 0x1a0   :  { %v345_v17 = vsel %vm215_vm2, %v340_v16, 0 }
 0x1a1   :  { %2616 = vmatpush3.bf16.xpose.msra.mxu1 %v345_v17  ;;  %v452_v20 = vpop.permute.xlu1 %451 }
 0x1a2   :  { %2627 = vmatprep.subr.bf16.mxu1 %v3062_v0 }
 0x1a3   :  { %v454_v18 = vpop.permute.xlu0 %453 }
 0x1a4   :  { %v459_v19 = vsel %vm215_vm2, %v454_v18, 0 }
 0x1a8   :  { %2618 = vmatmul.mubr.msk.bf16.vlgmr.msra.gmra.mrb[0].mxu1 %vm215_vm2, %v3290_v15 }
 0x1a9   :  { %2628 = vmatpush3.bf16.xpose.msra.mxu1 %v459_v19  ;;  %2629 = vmatprep.mubr.msk.bf16.mxu1 %vm3063_vm0, %v3062_v0 }
 0x1aa   :  { %2639 = vmatprep.subr.bf16.mxu1 %v3062_v0 }
 0x1b0   :  { %2630 = vmatmul.mubr.msk.bf16.vlgmr.msra.gmra.mrb[4].mxu1 %vm215_vm2, %v452_v20 }
 0x1b1   :  { %2641 = vmatprep.mubr.msk.bf16.mxu1 %vm3063_vm0, %v3062_v0  ;;  %2640 = vmatpush3.bf16.msra.mxu1 %v3338_v56 }
 0x1b2   :  { %2651 = vmatprep.subr.bf16.mxu1 %v3062_v0 }
 0x27b   :  { %v381_v21 = vpop.f32.mrb[0].mxu1 }
 0x27c   :  { %v2619_v22 = vpop.f32.mrb[1].mxu1  ;;  %v387_v23 = vsel %vm215_vm2, %v381_v21, -inf }
 0x27d   :  { %388 = vmax.xlane.f32.xlu1 %v387_v23  ;;  %v384_v24 = vpop.f32.mrb[2].mxu1 }
 0x27e   :  { %v2620_v25 = vpop.f32.mrb[3].mxu1 }
 0x283   :  { %v495_v26 = vpop.f32.mrb[4].mxu1 }
 0x284   :  { %v2631_v27 = vpop.f32.mrb[5].mxu1  ;;  %v501_v28 = vsel %vm215_vm2, %v495_v26, -inf }
 0x285   :  { %502 = vmax.xlane.f32.xlu0 %v501_v28  ;;  %v498_v29 = vpop.f32.mrb[6].mxu1 }
 0x286   :  { %v2632_v30 = vpop.f32.mrb[7].mxu1 }
 0x30a   :  { %v389_v31 = vpop.xlane.xlu1 %388 }
 0x30b   :  { %v390_v32 = vsub.f32 %v381_v21, %v389_v31 }
 0x30d   :  { %v391_v33 = vmul.f32 1.442695, %v390_v32 }
 0x30f   :  { %2907 = vpow2.f32 %v391_v33 }
 0x312   :  { %v503_v34 = vpop.xlane.xlu0 %502 }
 0x313   :  { %v504_v35 = vsub.f32 %v495_v26, %v503_v34 }
 0x315   :  { %v505_v36 = vmul.f32 1.442695, %v504_v35 }
 0x317   :  { %2909 = vpow2.f32 %v505_v36 }
 0x319   :  { %v2908_v37 = vpop.eup %2907 }
 0x31a   :  { %v393_v38 = vsel %vm215_vm2, %v2908_v37, 0.0 }
 0x31b   :  { %394 = vadd.xlane.f32.xlu0 %v393_v38 }
 0x321   :  { %v2910_v39 = vpop.eup %2909 }
 0x322   :  { %v507_v40 = vsel %vm215_vm2, %v2910_v39, 0.0 }
 0x323   :  { %508 = vadd.xlane.f32.xlu1 %v507_v40 }
 0x331   :  { %399 = vrot.lane.b32.xlu0 %v3286_v12, %s3067_s8 }
 0x334   :  { %513 = vrot.lane.b32.xlu1 %v3286_v12, %s3068_s14 }
 0x335   :  { %656 = vrot.lane.b32.xlu0 %v3290_v15, %s3069_s23 }
 0x338   :  { %658 = vrot.lane.b32.xlu1 %v3286_v12, %s3070_s26 }
 0x3a8   :  { %v395_v41 = vpop.xlane.xlu0 %394 }
 0x3a9   :  { %2911 = vrcp.f32 %v395_v41 }
 0x3ac   :  { %v400_v42 = vpop.permute.xlu0 %399 }
 0x3ad   :  { %v406_v43 = vsel %vm404_vm3, %v400_v42, 0 }
 0x3ae   :  { %2622 = vmatpush3.bf16.msra.mxu0 %v406_v43 }
 0x3af   :  { %2633 = vmatprep.subr.bf16.mxu0 %v3062_v0 }
 0x3b0   :  { %v509_v44 = vpop.xlane.xlu1 %508  ;;  %v657_v8 = vpop.permute.xlu0 %656 }
 0x3b1   :  { %2913 = vrcp.f32 %v509_v44 }
 0x3b3   :  { %v2912_v45 = vpop.eup %2911 }
 0x3b4   :  { %v397_v46 = vmul.f32 %v2912_v45, %v2908_v37  ;;  %v514_v47 = vpop.permute.xlu1 %513 }
 0x3b5   :  { %v519_v49 = vsel %vm404_vm3, %v514_v47, 0 }
 0x3b6   :  { %v398_v48 = vpack.c.bf16 %v397_v46, %v397_v46 }
 0x3b8   :  { %2624 = vmatmul.mubr.msk.bf16.vlgmr.msra.gmra.mrb[4].mxu0 %vm215_vm2, %v398_v48  ;;  %v659_v62 = vpop.permute.xlu1 %658 }
 0x3b9   :  { %2634 = vmatpush3.bf16.msra.mxu0 %v519_v49  ;;  %2635 = vmatprep.mubr.msk.bf16.mxu0 %vm3063_vm0, %v3062_v0  ;;  %v664_v6 = vsel %vm215_vm2, %v659_v62, 0 }
 0x3ba   :  { %2645 = vmatprep.subr.bf16.mxu0 %v3062_v0 }
 0x3bb   :  { %v2914_v50 = vpop.eup %2913 }
 0x3bc   :  { %v511_v51 = vmul.f32 %v2914_v50, %v2910_v39  ;;  %v2475_v39 = vld [vmem:[%s3138_s19 + $0x8] sm:$0xf] }
 0x3bd   :  { %v3376_v40 = vsel %vm404_vm3, %v2475_v39, 0 }
 0x3be   :  { %v512_v52 = vpack.c.bf16 %v511_v51, %v511_v51  ;;  %v3388_v51 = vpack.c.bf16 %v3288_v13, %v3288_v13 }
 0x3c0   :  { %2636 = vmatmul.mubr.msk.bf16.vlgmr.msra.gmra.mrb[8].mxu0 %vm215_vm2, %v512_v52 }
 0x3c1   :  { %2647 = vmatprep.mubr.msk.bf16.mxu0 %vm3063_vm0, %v3062_v0  ;;  %2646 = vmatpush3.bf16.msra.mxu0 %v3333_v54 }
 0x3c2   :  { %2657 = vmatprep.subr.bf16.mxu0 %v3062_v0 }
 0x48b   :  { %v442_v57 = vpop.f32.mrb[4].mxu0 }
 0x48c   :  { %v449_v58 = vpack.c.bf16 %v442_v57, %v442_v57  ;;  %v2625_v59 = vpop.f32.mrb[5].mxu0 }
 0x48d   :  { %v445_v60 = vpop.f32.mrb[6].mxu0 }
 0x48e   :  { %v2626_v61 = vpop.f32.mrb[7].mxu0  ;;  %2648 = vmatmul.mubr.msk.bf16.vlgmr.msra.gmra.mrb[12].mxu0 %vm215_vm2, %v449_v58  ;;  %v976_v60 = vmul.f32 0.35355338, %v3288_v13 }
 0x48f   :  { %2659 = vmatprep.mubr.msk.bf16.mxu0 %vm3063_vm0, %v3062_v0 }
 0x490   :  { %v3398_v61 = vpack.c.bf16 %v976_v60, %v976_v60 }
 0x493   :  { %v555_v63 = vpop.f32.mrb[8].mxu0 }
 0x494   :  { %v563_v1 = vpack.c.bf16 %v555_v63, %v555_v63  ;;  %v2637_v2 = vpop.f32.mrb[9].mxu0 }
 0x495   :  { %v558_v5 = vpop.f32.mrb[10].mxu0 }
 0x496   :  { %v2638_v7 = vpop.f32.mrb[11].mxu0  ;;  %2642 = vmatmul.mubr.msk.bf16.vlgmr.msra.gmra.mrb[8].mxu1 %vm215_vm2, %v563_v1 }
 0x497   :  { %2652 = vmatpush3.bf16.xpose.msra.mxu1 %v664_v6  ;;  %2653 = vmatprep.mubr.msk.bf16.mxu1 %vm3063_vm0, %v3062_v0 }
 0x498   :  { %2663 = vmatprep.subr.bf16.mxu1 %v3062_v0 }
 0x49e   :  { %2654 = vmatmul.mubr.msk.bf16.vlgmr.msra.gmra.mrb[12].mxu1 %vm215_vm2, %v657_v8 }
 0x49f   :  { %2665 = vmatprep.mubr.msk.bf16.mxu1 %vm3063_vm0, %v3062_v0  ;;  %2664 = vmatpush3.bf16.msra.mxu1 %v3376_v40 }
 0x4a0   :  { %2675 = vmatprep.subr.bf16.mxu1 %v3062_v0 }
 0x561   :  { %v650_v9 = vpop.f32.mrb[12].mxu0 }
 0x562   :  { %v2649_v10 = vpop.f32.mrb[13].mxu0 }
 0x563   :  { %v653_v11 = vpop.f32.mrb[14].mxu0 }
 0x564   :  { %v2650_v14 = vpop.f32.mrb[15].mxu0 }
 0x569   :  { %v604_v16 = vpop.f32.mrb[8].mxu1 }
 0x56a   :  { %v3354_v17 = vadd.f32 %v650_v9, %v604_v16  ;;  %v2643_v18 = vpop.f32.mrb[9].mxu1 }
 0x56b   :  { %v607_v19 = vpop.f32.mrb[10].mxu1 }
 0x56c   :  { %v2644_v20 = vpop.f32.mrb[11].mxu1 }
 0x571   :  { %v700_v21 = vpop.f32.mrb[12].mxu1 }
 0x572   :  { %v2655_v22 = vpop.f32.mrb[13].mxu1  ;;  %v706_v23 = vsel %vm215_vm2, %v700_v21, -inf }
 0x573   :  { %707 = vmax.xlane.f32.xlu1 %v706_v23  ;;  %v703_v24 = vpop.f32.mrb[14].mxu1 }
 0x574   :  { %v2656_v25 = vpop.f32.mrb[15].mxu1 }
 0x584   :  { %818 = vrot.lane.b32.xlu1 %v3286_v12, %s3071_s28 }
 0x588   :  { %816 = vrot.lane.b32.xlu1 %v3290_v15, %s3072_s1 }
 0x600   :  { %v708_v26 = vpop.xlane.xlu1 %707 }
 0x601   :  { %v709_v27 = vsub.f32 %v700_v21, %v708_v26 }
 0x603   :  { %v710_v28 = vmul.f32 1.442695, %v709_v27 }
 0x604   :  { %v819_v35 = vpop.permute.xlu1 %818 }
 0x605   :  { %2915 = vpow2.f32 %v710_v28  ;;  %v824_v37 = vsel %vm215_vm2, %v819_v35, 0 }
 0x608   :  { %v817_v38 = vpop.permute.xlu1 %816 }
 0x60f   :  { %v2916_v29 = vpop.eup %2915 }
 0x610   :  { %v712_v30 = vsel %vm215_vm2, %v2916_v29, 0.0 }
 0x611   :  { %713 = vadd.xlane.f32.xlu0 %v712_v30 }
 0x627   :  { %718 = vrot.lane.b32.xlu0 %v3286_v12, %s3073_s2 }
 0x69e   :  { %v714_v31 = vpop.xlane.xlu0 %713 }
 0x69f   :  { %2917 = vrcp.f32 %v714_v31 }
 0x6a2   :  { %v719_v32 = vpop.permute.xlu0 %718 }
 0x6a3   :  { %v724_v33 = vsel %vm404_vm3, %v719_v32, 0 }
 0x6a4   :  { %2658 = vmatpush3.bf16.msra.mxu0 %v724_v33 }
 0x6a5   :  { %2669 = vmatprep.subr.bf16.mxu0 %v3062_v0 }
 0x6a9   :  { %v2918_v15 = vpop.eup %2917 }
 0x6aa   :  { %v716_v34 = vmul.f32 %v2918_v15, %v2916_v29 }
 0x6ac   :  { %v717_v36 = vpack.c.bf16 %v716_v34, %v716_v34 }
 0x6ae   :  { %2660 = vmatmul.mubr.msk.bf16.vlgmr.msra.gmra.mrb[16].mxu0 %vm215_vm2, %v717_v36 }
 0x6af   :  { %2670 = vmatpush3.bf16.xpose.msra.mxu0 %v824_v37  ;;  %2671 = vmatprep.mubr.msk.bf16.mxu0 %vm3063_vm0, %v3062_v0 }
 0x6b0   :  { %2681 = vmatprep.subr.bf16.mxu0 %v3062_v0 }
 0x6b6   :  { %2672 = vmatmul.mubr.msk.bf16.vlgmr.msra.gmra.mrb[20].mxu0 %vm215_vm2, %v817_v38 }
 0x6b7   :  { %2683 = vmatprep.mubr.msk.bf16.mxu0 %vm3063_vm0, %v3062_v0 }
 0x781   :  { %v760_v41 = vpop.f32.mrb[16].mxu0 }
 0x782   :  { %v768_v42 = vpack.c.bf16 %v760_v41, %v760_v41  ;;  %v2661_v43 = vpop.f32.mrb[17].mxu0 }
 0x783   :  { %v763_v44 = vpop.f32.mrb[18].mxu0 }
 0x784   :  { %v2662_v45 = vpop.f32.mrb[19].mxu0  ;;  %2666 = vmatmul.mubr.msk.bf16.vlgmr.msra.gmra.mrb[16].mxu1 %vm215_vm2, %v768_v42 }
 0x785   :  { %2677 = vmatprep.mubr.msk.bf16.mxu1 %vm3063_vm0, %v3062_v0 }
 0x789   :  { %v860_v46 = vpop.f32.mrb[20].mxu0 }
 0x78a   :  { %v2673_v47 = vpop.f32.mrb[21].mxu0  ;;  %v866_v48 = vsel %vm215_vm2, %v860_v46, -inf }
 0x78b   :  { %867 = vmax.xlane.f32.xlu0 %v866_v48  ;;  %v863_v49 = vpop.f32.mrb[22].mxu0 }
 0x78c   :  { %v2674_v50 = vpop.f32.mrb[23].mxu0 }
 0x7a1   :  { %878 = vrot.lane.b32.xlu0 %v3286_v12, %s3074_s7 }
 0x7a5   :  { %1092 = vrot.lane.b32.xlu0 %v3388_v51, %s3066_s21 }
 0x818   :  { %v868_v52 = vpop.xlane.xlu0 %867 }
 0x819   :  { %v869_v53 = vsub.f32 %v860_v46, %v868_v52 }
 0x81b   :  { %v870_v55 = vmul.f32 1.442695, %v869_v53 }
 0x81c   :  { %v879_v57 = vpop.permute.xlu0 %878 }
 0x81d   :  { %2919 = vpow2.f32 %v870_v55  ;;  %v884_v58 = vsel %vm404_vm3, %v879_v57, 0 }
 0x81e   :  { %2676 = vmatpush3.bf16.msra.mxu1 %v884_v58 }
 0x81f   :  { %2687 = vmatprep.subr.bf16.mxu1 %v3062_v0 }
 0x820   :  { %v1093_v11 = vpop.permute.xlu0 %1092 }
 0x821   :  { %v1098_v14 = vsel %vm215_vm2, %v1093_v11, 0 }
 0x827   :  { %v2920_v59 = vpop.eup %2919 }
 0x828   :  { %v872_v12 = vsel %vm215_vm2, %v2920_v59, 0.0 }
 0x829   :  { %873 = vadd.xlane.f32.xlu1 %v872_v12 }
 0x83a   :  { %980 = vrot.lane.b32.xlu1 %v3388_v51, %s3064_s0  ;;  %s3717_s0 = sld [smem:[#allocation27_spill]] }
 0x83e   :  { %1090 = vrot.lane.b32.xlu1 %v3398_v61, %s3065_s5  ;;  %s3076_s5 = smov [#allocation5]  }
 0x83f   :  { %s2396_s21 = sshll.u32 %s3076_s5, 4  ;;  %s2397_s21 = int_to_ptr.vmem [resolvable:$true] %s2396_s21 }
 0x840   :  { %p2982_p9 = scmp.lt.s32.totalorder %s2397_s21, %s2397_s21 }
 0x857   :  { %v809_v62 = vpop.f32.mrb[16].mxu1 }
 0x858   :  { %v3403_v63 = vadd.f32 %v809_v62, %v3354_v17  ;;  %v2667_v1 = vpop.f32.mrb[17].mxu1  ;;  %v2479_v17 = vld [vmem:[%s3138_s19 + $0xc] sm:$0xf]  ;;  %s3706_s19 = sld [smem:[#allocation20_spill]] }
 0x859   :  { %v812_v2 = vpop.f32.mrb[18].mxu1  ;;  %v3423_v18 = vsel %vm404_vm3, %v2479_v17, 0 }
 0x85a   :  { %v2668_v5 = vpop.f32.mrb[19].mxu1  ;;  %2682 = vmatpush3.bf16.msra.mxu0 %v3423_v18 }
 0x85b   :  { %2693 = vmatprep.subr.bf16.mxu0 %v3062_v0 }
 0x8b6   :  { %v874_v6 = vpop.xlane.xlu1 %873 }
 0x8b7   :  { %2921 = vrcp.f32 %v874_v6 }
 0x8ba   :  { %v981_v13 = vpop.permute.xlu1 %980 }
 0x8bb   :  { %v986_v10 = vsel %vm215_vm2, %v981_v13, 0 }
 0x8be   :  { %v1091_v16 = vpop.permute.xlu1 %1090 }
 0x8c1   :  { %v2922_v7 = vpop.eup %2921 }
 0x8c2   :  { %v876_v8 = vmul.f32 %v2922_v7, %v2920_v59 }
 0x8c4   :  { %v877_v9 = vpack.c.bf16 %v876_v8, %v876_v8 }
 0x8c6   :  { %2678 = vmatmul.mubr.msk.bf16.vlgmr.msra.gmra.mrb[20].mxu1 %vm215_vm2, %v877_v9 }
 0x8c7   :  { %2688 = vmatpush3.bf16.xpose.msra.mxu1 %v986_v10  ;;  %2689 = vmatprep.mubr.msk.bf16.mxu1 %vm3063_vm0, %v3062_v0 }
 0x8c8   :  { %2699 = vmatprep.subr.bf16.mxu1 %v3062_v0 }
 0x8ce   :  { %2690 = vmatmul.mubr.msk.bf16.vlgmr.msra.gmra.mrb[24].mxu1 %vm215_vm2, %v3398_v61 }
 0x8cf   :  { %2700 = vmatpush3.bf16.xpose.msra.mxu1 %v1098_v14  ;;  %2701 = vmatprep.mubr.msk.bf16.mxu1 %vm3063_vm0, %v3062_v0 }
 0x8d0   :  { %2711 = vmatprep.subr.bf16.mxu1 %v3062_v0 }
 0x8d6   :  { %2702 = vmatmul.mubr.msk.bf16.vlgmr.msra.gmra.mrb[28].mxu1 %vm215_vm2, %v1091_v16 }
 0x8d7   :  { %2712 = vmatpush3.bf16.msra.mxu1 %v3338_v56  ;;  %2713 = vmatprep.mubr.msk.bf16.mxu1 %vm3063_vm0, %v3062_v0 }
 0x8d8   :  { %2723 = vmatprep.subr.bf16.mxu1 %v3062_v0 }
 0x999   :  { %v920_v19 = vpop.f32.mrb[20].mxu1 }
 0x99a   :  { %v928_v20 = vpack.c.bf16 %v920_v19, %v920_v19  ;;  %v2679_v21 = vpop.f32.mrb[21].mxu1 }
 0x99b   :  { %v923_v22 = vpop.f32.mrb[22].mxu1 }
 0x99c   :  { %v2680_v23 = vpop.f32.mrb[23].mxu1  ;;  %2684 = vmatmul.mubr.msk.bf16.vlgmr.msra.gmra.mrb[24].mxu0 %vm215_vm2, %v928_v20 }
 0x99d   :  { %2695 = vmatprep.mubr.msk.bf16.mxu0 %vm3063_vm0, %v3062_v0 }
 0x9a1   :  { %v1022_v56 = vpop.f32.mrb[24].mxu1 }
 0x9a2   :  { %v2691_v24 = vpop.f32.mrb[25].mxu1  ;;  %v1028_v25 = vsel %vm215_vm2, %v1022_v56, -inf }
 0x9a3   :  { %1029 = vmax.xlane.f32.xlu0 %v1028_v25  ;;  %v1025_v26 = vpop.f32.mrb[26].mxu1 }
 0x9a4   :  { %v2692_v27 = vpop.f32.mrb[27].mxu1 }
 0x9a9   :  { %v1134_v28 = vpop.f32.mrb[28].mxu1 }
 0x9aa   :  { %v2703_v29 = vpop.f32.mrb[29].mxu1  ;;  %v1140_v30 = vsel %vm215_vm2, %v1134_v28, -inf }
 0x9ab   :  { %1141 = vmax.xlane.f32.xlu1 %v1140_v30  ;;  %v1137_v31 = vpop.f32.mrb[30].mxu1 }
 0x9ac   :  { %v2704_v32 = vpop.f32.mrb[31].mxu1 }
 0x9bc   :  { %1040 = vrot.lane.b32.xlu1 %v3388_v51, %s3067_s8  ;;  %s2977_s8 = scalar_lea.vmem %s2397_s21, 256 }
 0x9bd   :  { %p2978_p8 = scmp.ne.s32.totalorder %s2397_s21, %s2977_s8  ;;  %p2983_p10 = scmp.lt.s32.totalorder %s2977_s8, %s2977_s8 }
 0x9bf   :  { %p2984_p11 = por %p2983_p10, %p2982_p9 }
 0x9c0   :  { %1289 = vrot.lane.b32.xlu1 %v3388_v51, %s3070_s26 }
 0x9c1   :  { %p2985_p12 = pnand %p2984_p11, %p2978_p8 }
 0x9c4   :  { %1287 = vrot.lane.b32.xlu1 %v3398_v61, %s3069_s23 }
 0xa30   :  { %v1030_v33 = vpop.xlane.xlu0 %1029 }
 0xa31   :  { %v1031_v15 = vsub.f32 %v1022_v56, %v1030_v33 }
 0xa33   :  { %v1032_v34 = vmul.f32 1.442695, %v1031_v15 }
 0xa35   :  { %2923 = vpow2.f32 %v1032_v34 }
 0xa38   :  { %v1142_v35 = vpop.xlane.xlu1 %1141 }
 0xa39   :  { %v1143_v36 = vsub.f32 %v1134_v28, %v1142_v35 }
 0xa3b   :  { %v1144_v37 = vmul.f32 1.442695, %v1143_v36 }
 0xa3c   :  { %v1041_v38 = vpop.permute.xlu1 %1040 }
 0xa3d   :  { %2925 = vpow2.f32 %v1144_v37  ;;  %v1046_v39 = vsel %vm404_vm3, %v1041_v38, 0 }
 0xa3e   :  { %2694 = vmatpush3.bf16.msra.mxu0 %v1046_v39 }
 0xa3f   :  { %v2924_v41 = vpop.eup %2923  ;;  %2705 = vmatprep.subr.bf16.mxu0 %v3062_v0 }
 0xa40   :  { %v1034_v42 = vsel %vm215_vm2, %v2924_v41, 0.0  ;;  %v1290_v7 = vpop.permute.xlu1 %1289 }
 0xa41   :  { %1035 = vadd.xlane.f32.xlu0 %v1034_v42  ;;  %v1295_v10 = vsel %vm215_vm2, %v1290_v7, 0 }
 0xa44   :  { %v1288_v14 = vpop.permute.xlu1 %1287 }
 0xa47   :  { %v2926_v43 = vpop.eup %2925 }
 0xa48   :  { %v1146_v44 = vsel %vm215_vm2, %v2926_v43, 0.0 }
 0xa49   :  { %1147 = vadd.xlane.f32.xlu0 %v1146_v44 }
 0xa5f   :  { %1152 = vrot.lane.b32.xlu0 %v3388_v51, %s3068_s14 }
 0xa6f   :  { %v969_v45 = vpop.f32.mrb[24].mxu0 }
 0xa70   :  { %v3445_v46 = vadd.f32 %v969_v45, %v3403_v63  ;;  %v2685_v47 = vpop.f32.mrb[25].mxu0 }
 0xa71   :  { %v972_v48 = vpop.f32.mrb[26].mxu0 }
 0xa72   :  { %v2686_v49 = vpop.f32.mrb[27].mxu0 }
 0xa73   :  { %v3496_v49 = vld [vmem:[%s3093_s9] sm:$0xff] }
 0xace   :  { %v1036_v50 = vpop.xlane.xlu0 %1035 }
 0xacf   :  { %2927 = vrcp.f32 %v1036_v50 }
 0xad6   :  { %v1148_v52 = vpop.xlane.xlu0 %1147 }
 0xad7   :  { %2929 = vrcp.f32 %v1148_v52 }
 0xad9   :  { %v2928_v53 = vpop.eup %2927 }
 0xada   :  { %v1038_v55 = vmul.f32 %v2928_v53, %v2924_v41  ;;  %v1153_v57 = vpop.permute.xlu0 %1152 }
 0xadb   :  { %v1158_v59 = vsel %vm404_vm3, %v1153_v57, 0  ;;  %v3502_v57 = vld [vmem:[%s3093_s9 + $0x8] sm:$0xff]  ;;  %s3701_s9 = sld [smem:[#allocation14_spill]] }
 0xadc   :  { %v1039_v58 = vpack.c.bf16 %v1038_v55, %v1038_v55  ;;  %v159_v55 = vsel %vm158_vm4, %v3496_v49, -inf }
 0xade   :  { %2696 = vmatmul.mubr.msk.bf16.vlgmr.msra.gmra.mrb[28].mxu0 %vm215_vm2, %v1039_v58  ;;  %v162_v58 = vsel %vm158_vm4, %v3502_v57, -inf }
 0xadf   :  { %2706 = vmatpush3.bf16.msra.mxu0 %v1158_v59  ;;  %2707 = vmatprep.mubr.msk.bf16.mxu0 %vm3063_vm0, %v3062_v0 }
 0xae0   :  { %2717 = vmatprep.subr.bf16.mxu0 %v3062_v0 }
 0xae1   :  { %v2930_v12 = vpop.eup %2929 }
 0xae2   :  { %v1150_v60 = vmul.f32 %v2930_v12, %v2926_v43 }
 0xae4   :  { %v1151_v62 = vpack.c.bf16 %v1150_v60, %v1150_v60 }
 0xae6   :  { %2708 = vmatmul.mubr.msk.bf16.vlgmr.msra.gmra.mrb[32].mxu0 %vm215_vm2, %v1151_v62 }
 0xae7   :  { %2718 = vmatpush3.bf16.msra.mxu0 %v3333_v54  ;;  %2719 = vmatprep.mubr.msk.bf16.mxu0 %vm3063_vm0, %v3062_v0 }
 0xae8   :  { %2729 = vmatprep.subr.bf16.mxu0 %v3062_v0 }
 0xbb1   :  { %v1082_v63 = vpop.f32.mrb[28].mxu0 }
 0xbb2   :  { %v1088_v1 = vpack.c.bf16 %v1082_v63, %v1082_v63  ;;  %v2697_v2 = vpop.f32.mrb[29].mxu0 }
 0xbb3   :  { %v1085_v5 = vpop.f32.mrb[30].mxu0 }
 0xbb4   :  { %v2698_v6 = vpop.f32.mrb[31].mxu0  ;;  %2720 = vmatmul.mubr.msk.bf16.vlgmr.msra.gmra.mrb[36].mxu0 %vm215_vm2, %v1088_v1 }
 0xbb5   :  { %2731 = vmatprep.mubr.msk.bf16.mxu0 %vm3063_vm0, %v3062_v0 }
 0xbb9   :  { %v1194_v8 = vpop.f32.mrb[32].mxu0 }
 0xbba   :  { %v1200_v13 = vpack.c.bf16 %v1194_v8, %v1194_v8  ;;  %v2709_v9 = vpop.f32.mrb[33].mxu0 }
 0xbbb   :  { %v1197_v54 = vpop.f32.mrb[34].mxu0 }
 0xbbc   :  { %v2710_v11 = vpop.f32.mrb[35].mxu0  ;;  %2714 = vmatmul.mubr.msk.bf16.vlgmr.msra.gmra.mrb[32].mxu1 %vm215_vm2, %v1200_v13  ;;  %v2493_v13 = vld [vmem:[%s3143_s24] ss:$0 sm:$0xff]  ;;  %s3707_s24 = sld [smem:[#allocation15_spill]] }
 0xbbd   :  { %2724 = vmatpush3.bf16.xpose.msra.mxu1 %v1295_v10  ;;  %2725 = vmatprep.mubr.msk.bf16.mxu1 %vm3063_vm0, %v3062_v0  ;;  %v1604_v54 = vadd.f32 %v2493_v13, %v3445_v46 }
 0xbbe   :  { %2735 = vmatprep.subr.bf16.mxu1 %v3062_v0 }
 0xbc4   :  { %2726 = vmatmul.mubr.msk.bf16.vlgmr.msra.gmra.mrb[36].mxu1 %vm215_vm2, %v1288_v14 }
 0xbc5   :  { %2736 = vmatpush3.bf16.msra.mxu1 %v3376_v40  ;;  %2737 = vmatprep.mubr.msk.bf16.mxu1 %vm3063_vm0, %v3062_v0 }
 0xbc6   :  { %2747 = vmatprep.subr.bf16.mxu1 %v3062_v0 }
 0xc87   :  { %v1281_v16 = vpop.f32.mrb[36].mxu0 }
 0xc88   :  { %v2721_v17 = vpop.f32.mrb[37].mxu0 }
 0xc89   :  { %v1284_v19 = vpop.f32.mrb[38].mxu0 }
 0xc8a   :  { %v2722_v20 = vpop.f32.mrb[39].mxu0 }
 0xc8f   :  { %v1238_v21 = vpop.f32.mrb[32].mxu1 }
 0xc90   :  { %v3470_v22 = vadd.f32 %v1281_v16, %v1238_v21  ;;  %v2715_v23 = vpop.f32.mrb[33].mxu1  ;;  %v1606_v16 = vadd.f32 %v1604_v54, %v3273_v3 }
 0xc91   :  { %v1241_v56 = vpop.f32.mrb[34].mxu1 }
 0xc92   :  { %v2716_v24 = vpop.f32.mrb[35].mxu1  ;;  %v1610_v17 = vsel %vm290_vm1, %v1606_v16, 0.0 }
 0xc97   :  { %v1331_v25 = vpop.f32.mrb[36].mxu1 }
 0xc98   :  { %v2727_v26 = vpop.f32.mrb[37].mxu1  ;;  %v1337_v27 = vsel %vm215_vm2, %v1331_v25, -inf }
 0xc99   :  { %1338 = vmax.xlane.f32.xlu0 %v1337_v27  ;;  %v1334_v40 = vpop.f32.mrb[38].mxu1 }
 0xc9a   :  { %v2728_v28 = vpop.f32.mrb[39].mxu1 }
 0xc9b   :  { %v2458_v28 = vld [vmem:[%s3118_s29] ss:$0 sm:$0xff]  ;;  %s3704_s29 = sld [smem:[#allocation13_spill]] }
 0xcaf   :  { %1349 = vrot.lane.b32.xlu0 %v3388_v51, %s3073_s2 }
 0xcb3   :  { %1442 = vrot.lane.b32.xlu0 %v3398_v61, %s3072_s1 }
 0xd26   :  { %v1339_v29 = vpop.xlane.xlu0 %1338 }
 0xd27   :  { %v1340_v30 = vsub.f32 %v1331_v25, %v1339_v29 }
 0xd29   :  { %v1341_v31 = vmul.f32 1.442695, %v1340_v30 }
 0xd2a   :  { %v1350_v32 = vpop.permute.xlu0 %1349 }
 0xd2b   :  { %2931 = vpow2.f32 %v1341_v31  ;;  %v1355_v33 = vsel %vm404_vm3, %v1350_v32, 0 }
 0xd2c   :  { %2730 = vmatpush3.bf16.msra.mxu0 %v1355_v33 }
 0xd2d   :  { %2741 = vmatprep.subr.bf16.mxu0 %v3062_v0 }
 0xd2e   :  { %v1443_v41 = vpop.permute.xlu0 %1442 }
 0xd35   :  { %v2932_v15 = vpop.eup %2931 }
 0xd36   :  { %v1343_v34 = vsel %vm215_vm2, %v2932_v15, 0.0 }
 0xd37   :  { %1344 = vadd.xlane.f32.xlu1 %v1343_v34 }
 0xd48   :  { %1444 = vrot.lane.b32.xlu1 %v3388_v51, %s3071_s28 }
 0xdc4   :  { %v1345_v35 = vpop.xlane.xlu1 %1344 }
 0xdc5   :  { %2933 = vrcp.f32 %v1345_v35 }
 0xdc8   :  { %v1445_v37 = vpop.permute.xlu1 %1444 }
 0xdc9   :  { %v1450_v39 = vsel %vm215_vm2, %v1445_v37, 0 }
 0xdcf   :  { %v2934_v61 = vpop.eup %2933 }
 0xdd0   :  { %v1347_v36 = vmul.f32 %v2934_v61, %v2932_v15 }
 0xdd2   :  { %v1348_v38 = vpack.c.bf16 %v1347_v36, %v1347_v36 }
 0xdd4   :  { %2732 = vmatmul.mubr.msk.bf16.vlgmr.msra.gmra.mrb[40].mxu0 %vm215_vm2, %v1348_v38 }
 0xdd5   :  { %2742 = vmatpush3.bf16.xpose.msra.mxu0 %v1450_v39  ;;  %2743 = vmatprep.mubr.msk.bf16.mxu0 %vm3063_vm0, %v3062_v0 }
 0xdd6   :  { %2753 = vmatprep.subr.bf16.mxu0 %v3062_v0 }
 0xddc   :  { %2744 = vmatmul.mubr.msk.bf16.vlgmr.msra.gmra.mrb[44].mxu0 %vm215_vm2, %v1443_v41 }
 0xddd   :  { %2754 = vmatpush3.bf16.msra.mxu0 %v3423_v18  ;;  %2755 = vmatprep.mubr.msk.bf16.mxu0 %vm3063_vm0, %v3062_v0 }
 0xdde   :  { %2765 = vmatprep.subr.bf16.mxu0 %v3062_v0 }
 0xea7   :  { %v1391_v42 = vpop.f32.mrb[40].mxu0 }
 0xea8   :  { %v1397_v43 = vpack.c.bf16 %v1391_v42, %v1391_v42  ;;  %v2733_v44 = vpop.f32.mrb[41].mxu0 }
 0xea9   :  { %v1394_v45 = vpop.f32.mrb[42].mxu0 }
 0xeaa   :  { %v2734_v47 = vpop.f32.mrb[43].mxu0  ;;  %2738 = vmatmul.mubr.msk.bf16.vlgmr.msra.gmra.mrb[40].mxu1 %vm215_vm2, %v1397_v43 }
 0xeab   :  { %2749 = vmatprep.mubr.msk.bf16.mxu1 %vm3063_vm0, %v3062_v0 }
 0xeaf   :  { %v1486_v48 = vpop.f32.mrb[44].mxu0 }
 0xeb0   :  { %v2745_v18 = vpop.f32.mrb[45].mxu0  ;;  %v1492_v50 = vsel %vm215_vm2, %v1486_v48, -inf }
 0xeb1   :  { %1493 = vmax.xlane.f32.xlu1 %v1492_v50  ;;  %v1489_v52 = vpop.f32.mrb[46].mxu0  ;;  %v2459_v18 = vld [vmem:[%s3123_s3] ss:$0 sm:$0xff]  ;;  %s3705_s3 = sld [smem:[#allocation21_spill]] }
 0xeb2   :  { %v2746_v53 = vpop.f32.mrb[47].mxu0 }
 0xeb5   :  { %160 = vmax.xlane.f32.xlu1 %v159_v55 }
 0xeb9   :  { %163 = vmax.xlane.f32.xlu1 %v162_v58 }
 0xf3e   :  { %v1494_v59 = vpop.xlane.xlu1 %1493 }
 0xf3f   :  { %v1495_v12 = vsub.f32 %v1486_v48, %v1494_v59 }
 0xf41   :  { %v1496_v60 = vmul.f32 1.442695, %v1495_v12 }
 0xf42   :  { %v161_v62 = vpop.xlane.xlu1 %160 }
 0xf43   :  { %2935 = vpow2.f32 %v1496_v60  ;;  %v165_v63 = vsub.f32 %v3496_v49, %v161_v62  ;;  %v1657_v62 = vld [vmem:[%s3163_s20] sm:$0xf]  ;;  %s3709_s20 = sld [smem:[#allocation17_spill]] }
 0xf45   :  { %v167_v1 = vmul.f32 1.442695, %v165_v63  ;;  %v1663_v63 = vsel %vm404_vm3, %v1657_v62, 0 }
 0xf46   :  { %v164_v2 = vpop.xlane.xlu1 %163 }
 0xf47   :  { %2937 = vpow2.f32 %v167_v1  ;;  %v166_v5 = vsub.f32 %v3502_v57, %v164_v2  ;;  %v1655_v1 = vld [vmem:[%s3098_s13] sm:$0xff]  ;;  %v1656_v2 = vld [vmem:[%s3098_s13 + $0x8] sm:$0xff]  ;;  %s3702_s13 = sld [smem:[#allocation16_spill]] }
 0xf49   :  { %v169_v6 = vmul.f32 1.442695, %v166_v5  ;;  %v3543_v5 = vpack.c.bf16 %v1656_v2, %v1655_v1 }
 0xf4b   :  { %2939 = vpow2.f32 %v169_v6  ;;  %v1653_v6 = vld [vmem:[%s3158_s12] sm:$0xf]  ;;  %s3708_s12 = sld [smem:[#allocation22_spill]] }
 0xf4d   :  { %v2936_v7 = vpop.eup %2935 }
 0xf4e   :  { %v1498_v8 = vsel %vm215_vm2, %v2936_v7, 0.0 }
 0xf4f   :  { %1499 = vadd.xlane.f32.xlu0 %v1498_v8  ;;  %v1710_v8 = vsel %vm404_vm3, %v1653_v6, 0 }
 0xf51   :  { %v2938_v9 = vpop.eup %2937 }
 0xf52   :  { %v171_v10 = vsel %vm158_vm4, %v2938_v9, 0.0 }
 0xf53   :  { %172 = vadd.xlane.f32.xlu1 %v171_v10 }
 0xf55   :  { %v2940_v11 = vpop.eup %2939 }
 0xf56   :  { %v174_v14 = vsel %vm158_vm4, %v2940_v11, 0.0 }
 0xf57   :  { %175 = vadd.xlane.f32.xlu1 %v174_v14 }
 0xf5b   :  { %1611 = vadd.xlane.f32.xlu1 %v1610_v17 }
 0xf65   :  { %1504 = vrot.lane.b32.xlu0 %v3388_v51, %s3074_s7 }
 0xf7d   :  { %v1435_v19 = vpop.f32.mrb[40].mxu1 }
 0xf7e   :  { %v1441_v20 = vadd.f32 %v1435_v19, %v3470_v22  ;;  %v2739_v21 = vpop.f32.mrb[41].mxu1 }
 0xf7f   :  { %v1438_v46 = vpop.f32.mrb[42].mxu1 }
 0xf80   :  { %v2740_v23 = vpop.f32.mrb[43].mxu1 }
 0xf81   :  { %v213_v23 = vld [vmem:[%s3103_s17 + $0x8] sm:$0xff] }
 0xfdc   :  { %v1500_v56 = vpop.xlane.xlu0 %1499 }
 0xfdd   :  { %2941 = vrcp.f32 %v1500_v56 }
 0xfe0   :  { %v1505_v24 = vpop.permute.xlu0 %1504  ;;  %v173_v51 = vpop.xlane.xlu1 %172 }
 0xfe1   :  { %v1510_v25 = vsel %vm404_vm3, %v1505_v24, 0  ;;  %2943 = vrcp.f32 %v173_v51 }
 0xfe2   :  { %2748 = vmatpush3.bf16.msra.mxu1 %v1510_v25 }
 0xfe3   :  { %2759 = vmatprep.subr.bf16.mxu1 %v3062_v0 }
 0xfe4   :  { %v176_v35 = vpop.xlane.xlu1 %175 }
 0xfe5   :  { %2945 = vrcp.f32 %v176_v35 }
 0xfe7   :  { %v2942_v3 = vpop.eup %2941 }
 0xfe8   :  { %v1502_v26 = vmul.f32 %v2942_v3, %v2936_v7  ;;  %v1612_v48 = vpop.xlane.xlu1 %1611  ;;  %v2894_v7 = vld [vmem:[%s3168_s27] sm:$0xff]   ;;  %s3710_s27 = sld [smem:[#allocation23_spill]] }
 0xfe9   :  { %v1617_v50 = vmul.f32 0.03125, %v1612_v48  ;;  %v211_v48 = vld [vmem:[#allocation2] sm:$0x3] }
 0xfea   :  { %v1503_v27 = vpack.c.bf16 %v1502_v26, %v1502_v26 }
 0xfeb   :  { %v2944_v22 = vpop.eup %2943  ;;  %v3532_v55 = vsub.f32 %v1606_v16, %v1617_v50 }
 0xfec   :  { %2750 = vmatmul.mubr.msk.bf16.vlgmr.msra.gmra.mrb[44].mxu1 %vm215_vm2, %v1503_v27  ;;  %v179_v40 = vmul.f32 %v2944_v22, %v2938_v9  ;;  %v212_v9 = vld [vmem:[%s3103_s17] sm:$0xff]  ;;  %v2461_v22 = vld [vmem:[%s3103_s17 + $0x18] sm:$0xff] }
 0xfed   :  { %2761 = vmatprep.mubr.msk.bf16.mxu1 %vm3063_vm0, %v3062_v0  ;;  %v1621_v12 = vmul.f32 %v3532_v55, %v3532_v55  ;;  %2760 = vmatpush3.bf16.msra.mxu1 %v1663_v63 }
 0xfee   :  { %v188_v29 = vmul.f32 %v2458_v28, %v179_v40  ;;  %v203_v53 = vmul.f32 %v2459_v18, %v179_v40  ;;  %2771 = vmatprep.subr.bf16.mxu1 %v3062_v0 }
 0xfef   :  { %v2946_v61 = vpop.eup %2945  ;;  %v1623_v60 = vsel %vm290_vm1, %v1621_v12, 0.0 }
 0xff0   :  { %v190_v30 = vsel %vm158_vm4, %v188_v29, 0.0  ;;  %v180_v43 = vmul.f32 %v2946_v61, %v2940_v11  ;;  %v205_v58 = vsel %vm158_vm4, %v203_v53, 0.0 }
 0xff1   :  { %191 = vadd.xlane.f32.xlu0 %v190_v30 }
 0xff2   :  { %v189_v47 = vmul.f32 %v2458_v28, %v180_v43 }
 0xff4   :  { %v193_v52 = vsel %vm158_vm4, %v189_v47, 0.0  ;;  %2762 = vmatmul.mubr.msk.bf16.vlgmr.msra.gmra.mrb[48].mxu1 %vm215_vm2, %v3543_v5  ;;  %v234_v47 = vlaneseq }
 0xff5   :  { %2773 = vmatprep.mubr.msk.bf16.mxu1 %vm3063_vm0, %v3062_v0  ;;  %2772 = vmatpush3.bf16.msra.mxu1 %v2894_v7 }
 0xff6   :  { %2785 = vmatprep.subr.bf16.mxu1 %v3062_v0 }
0x107e   :  { %v192_v54 = vpop.xlane.xlu0 %191 }
0x107f   :  { %v214_v10 = vmul.f32 %v212_v9, %v192_v54  ;;  %v2896_v9 = vld [vmem:[%s3701_s9 + $0x8] sm:$0xff]  }
0x1081   :  { %v216_v11 = vsel %vm215_vm2, %v214_v10, 0.0 }
0x1082   :  { %v217_v16 = vrot.slane %v216_v11, 4 }
0x10bf   :  { %v1546_v31 = vpop.f32.mrb[44].mxu1 }
0x10c0   :  { %v1552_v32 = vpack.c.bf16 %v1546_v31, %v1546_v31  ;;  %v2751_v33 = vpop.f32.mrb[45].mxu1 }
0x10c1   :  { %v1549_v15 = vpop.f32.mrb[46].mxu1 }
0x10c2   :  { %v2752_v34 = vpop.f32.mrb[47].mxu1  ;;  %2756 = vmatmul.mubr.msk.bf16.vlgmr.msra.gmra.mrb[48].mxu0 %vm215_vm2, %v1552_v32 }
0x10c3   :  { %2767 = vmatprep.mubr.msk.bf16.mxu0 %vm3063_vm0, %v3062_v0  ;;  %2766 = vmatpush3.bf16.msra.mxu0 %v1710_v8  ;;  %v2895_v8 = vld [vmem:[%s3701_s9] sm:$0xff]  }
0x10c4   :  { %2777 = vmatprep.subr.bf16.mxu0 %v3062_v0 }
0x10c7   :  { %v1699_v54 = vpop.f32.mrb[48].mxu1 }
0x10c8   :  { %v2763_v10 = vpop.f32.mrb[49].mxu1 }
0x1195   :  { %v1590_v36 = vpop.f32.mrb[48].mxu0 }
0x1196   :  { %v1596_v37 = vadd.f32 %v1590_v36, %v1441_v20  ;;  %v2757_v38 = vpop.f32.mrb[49].mxu0  ;;  %v218_v20 = vadd.f32 %v217_v16, %v216_v11  ;;  %v1702_v11 = vpop.f32.mrb[50].mxu1 }
0x1197   :  { %v1593_v39 = vpop.f32.mrb[50].mxu0 }
0x1198   :  { %v1605_v41 = vadd.f32 %v2493_v13, %v1596_v37  ;;  %v2758_v42 = vpop.f32.mrb[51].mxu0  ;;  %v3555_v13 = vpack.c.bf16 %v3502_v57, %v3496_v49  ;;  %v2460_v57 = vld [vmem:[%s3103_s17 + $0x10] sm:$0xff]  ;;  %v219_v26 = vrot.slane %v218_v20, 2  ;;  %s3703_s17 = sld [smem:[#allocation12_spill]] }
0x119a   :  { %v1607_v44 = vadd.f32 %v1605_v41, %v3276_v4  ;;  %v204_v4 = vmul.f32 %v2459_v18, %v180_v43  ;;  %2774 = vmatmul.mubr.msk.bf16.vlgmr.msra.gmra.mrb[52].mxu1 %vm158_vm4, %v3555_v13  ;;  %v220_v30 = vadd.f32 %v219_v26, %v218_v20 }
0x119b   :  { %2793 = vmatprep.mubr.msk.bf16.mxu1 %vm3063_vm0, %v3062_v0 }
0x119c   :  { %v1613_v45 = vsel %vm290_vm1, %v1607_v44, 0.0  ;;  %v208_v59 = vsel %vm158_vm4, %v204_v4, 0.0  ;;  %v221_v61 = vrot.slane %v220_v30, 1  ;;  %v235_v4 = vshrl.u32 %v234_v47, 7 }
0x119d   :  { %1614 = vadd.xlane.f32.xlu1 %v1613_v45 }
0x119e   :  { %v222_v42 = vadd.f32 %v221_v61, %v220_v30  ;;  %v236_v62 = vsub.s32 0, %v235_v4  ;;  %v262_v63 = vsub.s32 1, %v235_v4  ;;  %v2018_v30 = vld [vmem:[%s3705_s3] sm:$0xf] }
0x11a1   :  { %194 = vadd.xlane.f32.xlu1 %v193_v52 }
0x11a5   :  { %206 = vadd.xlane.f32.xlu1 %v205_v58 }
0x11a9   :  { %209 = vadd.xlane.f32.xlu1 %v208_v59 }
0x11ad   :  { %1624 = vadd.xlane.f32.xlu1 %v1623_v60 }
0x122a   :  { %v1615_v14 = vpop.xlane.xlu1 %1614 }
0x122b   :  { %v1618_v49 = vmul.f32 0.03125, %v1615_v14  ;;  %v2764_v14 = vpop.f32.mrb[51].mxu1 }
0x122d   :  { %v3566_v17 = vsub.f32 %v1607_v44, %v1618_v49 }
0x122e   :  { %v195_v19 = vpop.xlane.xlu1 %194 }
0x122f   :  { %v241_v21 = vmul.f32 %v2460_v57, %v195_v19  ;;  %v1622_v46 = vmul.f32 %v3566_v17, %v3566_v17  ;;  %v2897_v19 = vld [vmem:[%s3702_s13] sm:$0xff]  }
0x1230   :  { %2786 = vmatpush3.bf16.msra.mxu1 %v2897_v19 }
0x1231   :  { %v242_v56 = vsel %vm215_vm2, %v241_v21, 0.0  ;;  %v1626_v24 = vsel %vm290_vm1, %v1622_v46, 0.0  ;;  %2787 = vmatprep.subr.bf16.mxu1 %v3062_v0 }
0x1232   :  { %v243_v25 = vrot.slane %v242_v56, 4  ;;  %1627 = vadd.xlane.f32.xlu1 %v1626_v24  ;;  %v207_v3 = vpop.xlane.xlu1 %206 }
0x1233   :  { %v223_v27 = vmul.f32 %v213_v23, %v207_v3 }
0x1234   :  { %v244_v51 = vadd.f32 %v243_v25, %v242_v56 }
0x1235   :  { %v224_v40 = vsel %vm215_vm2, %v223_v27, 0.0  ;;  %v2494_v27 = vld [vmem:[%s3703_s17] ss:$0 sm:$0xff] }
0x1236   :  { %v225_v28 = vrot.slane %v224_v40, 4  ;;  %v210_v29 = vpop.xlane.xlu1 %209  ;;  %v245_v32 = vrot.slane %v244_v51, 2 }
0x1237   :  { %v249_v31 = vmul.f32 %v2461_v22, %v210_v29 }
0x1238   :  { %v226_v33 = vadd.f32 %v225_v28, %v224_v40  ;;  %v246_v36 = vadd.f32 %v245_v32, %v244_v51  ;;  %v2495_v28 = vld [vmem:[%s3704_s29] ss:$0 sm:$0xff] }
0x1239   :  { %v250_v15 = vsel %vm215_vm2, %v249_v31, 0.0 }
0x123a   :  { %v227_v34 = vrot.slane %v226_v33, 2  ;;  %v251_v35 = vrot.slane %v250_v15, 4  ;;  %v247_v43 = vrot.slane %v246_v36, 1  ;;  %v1625_v21 = vpop.xlane.xlu1 %1624 }
0x123b   :  { %v1629_v46 = vmul.f32 0.03125, %v1625_v21 }
0x123c   :  { %v228_v37 = vadd.f32 %v227_v34, %v226_v33  ;;  %v252_v38 = vadd.f32 %v251_v35, %v250_v15  ;;  %v248_v52 = vadd.f32 %v247_v43, %v246_v36  ;;  %v2024_v15 = vsel %vm404_vm3, %v2018_v30, 0  ;;  %v2900_v43 = vld [vmem:[%s3702_s13 + $0x18] sm:$0xff]  }
0x123d   :  { %v1631_v23 = vadd.f32 1e-05, %v1629_v46 }
0x123e   :  { %v229_v39 = vrot.slane %v228_v37, 1  ;;  %v253_v41 = vrot.slane %v252_v38, 2 }
0x123f   :  { %2947 = vrsqrt.f32 %v1631_v23 }
0x1240   :  { %v230_v44 = vadd.f32 %v229_v39, %v228_v37  ;;  %v254_v45 = vadd.f32 %v253_v41, %v252_v38  ;;  %v2898_v41 = vld [vmem:[%s3702_s13 + $0x8] sm:$0xff]  }
0x1241   :  { %2788 = vmatpush3.bf16.msra.mxu1 %v2898_v41 }
0x1242   :  { %v231_v18 = vadd.f32 %v230_v44, %v222_v42  ;;  %v255_v50 = vrot.slane %v254_v45, 1  ;;  %2789 = vmatprep.subr.bf16.mxu1 %v3062_v0  ;;  %v2899_v42 = vld [vmem:[%s3702_s13 + $0x10] sm:$0xff]  }
0x1244   :  { %v232_v53 = vsub.f32 %v211_v48, %v231_v18  ;;  %v256_v58 = vadd.f32 %v255_v50, %v254_v45  ;;  %v2503_v45 = vld [vmem:[%s3707_s24] ss:$0 sm:$0xff] }
0x1245   :  { %2790 = vmatpush3.bf16.msra.mxu1 %v2899_v42 }
0x1246   :  { %v257_v59 = vadd.f32 %v256_v58, %v248_v52  ;;  %v233_v12 = vmul.f32 0.25, %v232_v53  ;;  %2791 = vmatprep.subr.bf16.mxu1 %v3062_v0 }
0x1248   :  { %v258_v60 = vsub.f32 %v211_v48, %v257_v59  ;;  %v237_v2 = vrot.slane %v233_v12, %v236_v62 }
0x1249   :  { %v2948_v3 = vpop.eup %2947  ;;  %2792 = vmatpush3.bf16.msra.mxu1 %v2900_v43  ;;  %v2510_v43 = vld [vmem:[%s3712_s11] ss:$0 sm:$0xff] }
0x124a   :  { %v259_v1 = vmul.f32 0.25, %v258_v60  ;;  %v1635_v26 = vmul.f32 %v2948_v3, %v3532_v55  ;;  %v2015_v55 = vld [vmem:[%s3706_s19] sm:$0xf]  ;;  %2809 = vmatprep.subr.bf16.mxu1 %v3062_v0 }
0x124b   :  { %v2901_v60 = vld [vmem:[%s3708_s12] sm:$0xff]  }
0x124c   :  { %v263_v6 = vrot.slane %v259_v1, %v262_v63  ;;  %v1643_v22 = vmul.f32 %v2494_v27, %v1635_v26 }
0x124e   :  { %v1654_v7 = vpack.c.bf16 %v263_v6, %v237_v2  ;;  %v3590_v31 = vadd.f32 %v2495_v28, %v1643_v22 }
0x1250   :  { %2768 = vmatmul.mubr.msk.bf16.vlgmr.msra.gmra.mrb[52].mxu0 %vm215_vm2, %v1654_v7 }
0x1251   :  { %2778 = vmatpush3.bf16.msra.mxu0 %v2895_v8  ;;  %2781 = vmatprep.mubr.msk.bf16.mxu0 %vm3063_vm0, %v3062_v0 }
0x1252   :  { %2779 = vmatprep.subr.bf16.mxu0 %v3062_v0 }
0x1255   :  { %2780 = vmatpush3.bf16.msra.mxu0 %v2896_v9 }
0x1256   :  { %2797 = vmatprep.subr.bf16.mxu0 %v3062_v0 }
0x126d   :  { %v1799_v16 = vpop.f32.mrb[52].mxu1 }
0x126e   :  { %v2775_v49 = vpop.f32.mrb[53].mxu1 }
0x126f   :  { %v1802_v57 = vpop.f32.mrb[54].mxu1 }
0x1270   :  { %v2776_v20 = vpop.f32.mrb[55].mxu1 }
0x12bf   :  { %v1628_v56 = vpop.xlane.xlu1 %1627 }
0x12c0   :  { %v1630_v24 = vmul.f32 0.03125, %v1628_v56 }
0x12c2   :  { %v1632_v25 = vadd.f32 1e-05, %v1630_v24 }
0x12c4   :  { %2949 = vrsqrt.f32 %v1632_v25 }
0x12ce   :  { %v2950_v51 = vpop.eup %2949 }
0x12cf   :  { %v1636_v40 = vmul.f32 %v2950_v51, %v3566_v17  ;;  %v2068_v17 = vsel %vm404_vm3, %v2015_v55, 0  ;;  %v2902_v55 = vld [vmem:[%s3710_s27] sm:$0xff]  }
0x12d1   :  { %v1644_v29 = vmul.f32 %v2494_v27, %v1636_v40 }
0x12d3   :  { %v3592_v32 = vadd.f32 %v2495_v28, %v1644_v29 }
0x12d5   :  { %v1812_v33 = vpack.c.bf16 %v3592_v32, %v3590_v31 }
0x12d7   :  { %2782 = vmatmul.mubr.msk.bf16.vlgmr.msra.gmra.mrb[56].mxu0 %vm290_vm1, %v1812_v33 }
0x12d8   :  { %2798 = vmatpush3.bf16.msra.mxu0 %v2024_v15  ;;  %2799 = vmatprep.mubr.msk.bf16.mxu0 %vm3063_vm0, %v3062_v0 }
0x12d9   :  { %2803 = vmatprep.subr.bf16.mxu0 %v3062_v0 }
0x12df   :  { %2800 = vmatmul.mubr.msk.bf16.vlgmr.msra.gmra.mrb[60].mxu0 %vm215_vm2, %v3543_v5 }
0x12e0   :  { %2804 = vmatpush3.bf16.msra.mxu0 %v2068_v17  ;;  %2805 = vmatprep.mubr.msk.bf16.mxu0 %vm3063_vm0, %v3062_v0  ;;  %v2903_v17 = vld [vmem:[%s3710_s27 + $0x8] sm:$0xff]  }
0x12e1   :  { %2815 = vmatprep.subr.bf16.mxu0 %v3062_v0 }
0x12e7   :  { %2806 = vmatmul.mubr.msk.bf16.vlgmr.msra.gmra.mrb[64].mxu0 %vm215_vm2, %v1654_v7 }
0x12e8   :  { %2819 = vmatprep.mubr.msk.bf16.mxu0 %vm3063_vm0, %v3062_v0  ;;  %2816 = vmatpush3.bf16.msra.mxu0 %v2902_v55 }
0x12e9   :  { %2817 = vmatprep.subr.bf16.mxu0 %v3062_v0 }
0x12ec   :  { %2818 = vmatpush3.bf16.msra.mxu0 %v2903_v17 }
0x12ed   :  { %2831 = vmatprep.subr.bf16.mxu0 %v3062_v0 }
0x1323   :  { %v1746_v34 = vpop.f32.mrb[52].mxu0 }
0x1324   :  { %v1747_v35 = vadd.f32 %v1746_v34, %v1699_v54  ;;  %v2769_v61 = vpop.f32.mrb[53].mxu0  ;;  %v2225_v34 = vld [vmem:[%s3711_s10] sm:$0xff] }
0x1325   :  { %v1749_v36 = vpop.f32.mrb[54].mxu0  ;;  %v3075_v61 = vmov 0  }
0x1326   :  { %v1750_v37 = vadd.f32 %v1749_v36, %v1702_v11  ;;  %v1806_v5 = vadd.f32 %v1799_v16, %v1747_v35  ;;  %v2770_v38 = vpop.f32.mrb[55].mxu0  ;;  %v2504_v11 = vld [vmem:[%s3709_s20] ss:$0 sm:$0xff]  ;;  %v2226_v35 = vld [vmem:[%s3711_s10 + $0x8] sm:$0xff]  ;;  %2890 = vset.pattern.permute.xlu0 %v3075_v61  ;;  %2891 = vset.pattern.permute.xlu1 %v3075_v61 }
0x1328   :  { %v1807_v39 = vadd.f32 %v1802_v57, %v1750_v37 }
0x13aa   :  { %v1862_v44 = vpop.f32.mrb[56].mxu0 }
0x13ab   :  { %v1869_v47 = vadd.f32 %v1862_v44, %v1806_v5  ;;  %v2783_v48 = vpop.f32.mrb[57].mxu0 }
0x13ac   :  { %v1865_v18 = vpop.f32.mrb[58].mxu0 }
0x13ad   :  { %v1878_v50 = vadd.f32 %v2503_v45, %v1869_v47  ;;  %v1870_v52 = vadd.f32 %v1865_v18, %v1807_v39  ;;  %v2784_v53 = vpop.f32.mrb[59].mxu0 }
0x13af   :  { %v1879_v58 = vadd.f32 %v2503_v45, %v1870_v52  ;;  %v1880_v4 = vmax.f32 %v1878_v50, 0.0  ;;  %v2511_v45 = vld [vmem:[%s3713_s15] ss:$0 sm:$0xff] }
0x13b1   :  { %v1881_v59 = vmax.f32 %v1879_v58, 0.0 }
0x13b2   :  { %v2060_v12 = vpop.f32.mrb[60].mxu0 }
0x13b3   :  { %v1890_v62 = vpack.c.bf16 %v1881_v59, %v1880_v4  ;;  %v2801_v63 = vpop.f32.mrb[61].mxu0  ;;  %v2904_v4 = vld [vmem:[%s3714_s16] sm:$0xff]   ;;  %v2905_v59 = vld [vmem:[%s3714_s16 + $0x8] sm:$0xff]  }
0x13b4   :  { %v2063_v1 = vpop.f32.mrb[62].mxu0 }
0x13b5   :  { %2794 = vmatmul.mubr.msk.bf16.vlgmr.msra.gmra.mrb[56].mxu1 %vm1922_vm5, %v1890_v62  ;;  %v2802_v2 = vpop.f32.mrb[63].mxu0 }
0x13b6   :  { %2810 = vmatpush3.bf16.msra.mxu1 %v2901_v60  ;;  %2811 = vmatprep.mubr.msk.bf16.mxu1 %vm3063_vm0, %v3062_v0 }
0x13b7   :  { %2823 = vmatprep.subr.bf16.mxu1 %v3062_v0 }
0x13ba   :  { %v2104_v6 = vpop.f32.mrb[64].mxu0 }
0x13bb   :  { %v2105_v7 = vadd.f32 %v2104_v6, %v2060_v12  ;;  %v2807_v8 = vpop.f32.mrb[65].mxu0  ;;  %v2519_v12 = vld [vmem:[%s3715_s18] ss:$0 sm:$0xff] }
0x13bc   :  { %v2107_v9 = vpop.f32.mrb[66].mxu0  ;;  %v2520_v8 = vld [vmem:[%s3716_s22] ss:$0 sm:$0xff] }
0x13bd   :  { %v2108_v54 = vadd.f32 %v2107_v9, %v2063_v1  ;;  %v2808_v10 = vpop.f32.mrb[67].mxu0  ;;  %2812 = vmatmul.mubr.msk.bf16.vlgmr.msra.gmra.mrb[60].mxu1 %vm158_vm4, %v3555_v13 }
0x13be   :  { %2827 = vmatprep.mubr.msk.bf16.mxu1 %vm3063_vm0, %v3062_v0  ;;  %2824 = vmatpush3.bf16.msra.mxu1 %v2904_v4 }
0x13bf   :  { %2825 = vmatprep.subr.bf16.mxu1 %v3062_v0 }
0x13c2   :  { %2826 = vmatpush3.bf16.msra.mxu1 %v2905_v59 }
0x1488   :  { %v1960_v14 = vpop.f32.mrb[56].mxu1 }
0x1489   :  { %v1961_v16 = vadd.f32 %v2504_v11, %v1960_v14  ;;  %v2795_v49 = vpop.f32.mrb[57].mxu1 }
0x148a   :  { %v1963_v57 = vpop.f32.mrb[58].mxu1 }
0x148b   :  { %v1964_v19 = vadd.f32 %v2504_v11, %v1963_v57  ;;  %v2796_v20 = vpop.f32.mrb[59].mxu1  ;;  %v1967_v21 = vadd.f32 %v1961_v16, %v3590_v31 }
0x148c   :  { %v2906_v20 = vld [vmem:[%s3243_s6] sm:$0xff]  }
0x148d   :  { %v1971_v46 = vsel %vm290_vm1, %v1967_v21, 0.0  ;;  %v1968_v23 = vadd.f32 %v1964_v19, %v3592_v32 }
0x148e   :  { %1972 = vadd.xlane.f32.xlu1 %v1971_v46 }
0x148f   :  { %v1974_v25 = vsel %vm290_vm1, %v1968_v23, 0.0 }
0x1490   :  { %v2153_v56 = vpop.f32.mrb[60].mxu1 }
0x1491   :  { %v3630_v24 = vadd.f32 %v2153_v56, %v2105_v7  ;;  %v2813_v13 = vpop.f32.mrb[61].mxu1 }
0x1492   :  { %1975 = vadd.xlane.f32.xlu1 %v1974_v25  ;;  %v2156_v3 = vpop.f32.mrb[62].mxu1 }
0x1493   :  { %v3633_v26 = vadd.f32 %v2156_v3, %v2108_v54  ;;  %v2814_v27 = vpop.f32.mrb[63].mxu1 }
0x151b   :  { %v1973_v51 = vpop.xlane.xlu1 %1972 }
0x151c   :  { %v1977_v22 = vmul.f32 0.03125, %v1973_v51 }
0x151e   :  { %v1979_v40 = vsub.f32 %v1967_v21, %v1977_v22  ;;  %v2521_v21 = vld [vmem:[%s3717_s0] ss:$0 sm:$0xff] }
0x151f   :  { %v1976_v28 = vpop.xlane.xlu1 %1975 }
0x1520   :  { %v1978_v29 = vmul.f32 0.03125, %v1976_v28  ;;  %v1981_v30 = vmul.f32 %v1979_v40, %v1979_v40 }
0x1522   :  { %v1980_v31 = vsub.f32 %v1968_v23, %v1978_v29  ;;  %v1983_v32 = vsel %vm290_vm1, %v1981_v30, 0.0 }
0x1523   :  { %1984 = vadd.xlane.f32.xlu0 %v1983_v32 }
0x1524   :  { %v1982_v33 = vmul.f32 %v1980_v31, %v1980_v31 }
0x1526   :  { %v1986_v15 = vsel %vm290_vm1, %v1982_v33, 0.0 }
0x1527   :  { %1987 = vadd.xlane.f32.xlu1 %v1986_v15 }
0x1538   :  { %2235 = vperm.xlu1 %2891, %v2226_v35  }
0x1539   :  { %2230 = vperm.xlu0 %2890, %v2225_v34  }
0x15b0   :  { %v1985_v36 = vpop.xlane.xlu0 %1984 }
0x15b1   :  { %v1989_v37 = vmul.f32 0.03125, %v1985_v36 }
0x15b3   :  { %v1991_v5 = vadd.f32 1e-05, %v1989_v37 }
0x15b4   :  { %v1988_v38 = vpop.xlane.xlu1 %1987 }
0x15b5   :  { %2951 = vrsqrt.f32 %v1991_v5  ;;  %v1990_v39 = vmul.f32 0.03125, %v1988_v38 }
0x15b7   :  { %v1992_v41 = vadd.f32 1e-05, %v1990_v39 }
0x15b8   :  { %v2231_v60 = vpop.permute.xlu0 %2230  ;;  %v2236_v62 = vpop.permute.xlu1 %2235 }
0x15b9   :  { %2953 = vrsqrt.f32 %v1992_v41  ;;  %v2244_v63 = vmul.f32 %v2519_v12, %v2231_v60  ;;  %v2245_v7 = vmul.f32 %v2519_v12, %v2236_v62 }
0x15bf   :  { %v2952_v42 = vpop.eup %2951 }
0x15c0   :  { %v1995_v44 = vmul.f32 %v2952_v42, %v1979_v40 }
0x15c2   :  { %v2003_v47 = vmul.f32 %v2510_v43, %v1995_v44 }
0x15c3   :  { %v2954_v48 = vpop.eup %2953 }
0x15c4   :  { %v1996_v18 = vmul.f32 %v2954_v48, %v1980_v31  ;;  %v2011_v50 = vadd.f32 %v2511_v45, %v2003_v47 }
0x15c6   :  { %v2004_v52 = vmul.f32 %v2510_v43, %v1996_v18  ;;  %2013 = vst.msk [vmem:[#allocation5] sm:$0xff] %vm290_vm1, %v2011_v50 }
0x15c8   :  { %v2012_v53 = vadd.f32 %v2511_v45, %v2004_v52 }
0x15ca   :  { %v2166_v58 = vpack.c.bf16 %v2012_v53, %v2011_v50  ;;  %2014 = vst.msk [vmem:[#allocation5 + $0x8] sm:$0xff] %vm290_vm1, %v2012_v53 }
0x15cc   :  { %2820 = vmatmul.mubr.msk.bf16.vlgmr.msra.gmra.mrb[68].mxu0 %vm290_vm1, %v2166_v58 }
0x15cd   :  { %2833 = vmatprep.mubr.msk.bf16.mxu0 %vm3063_vm0, %v3062_v0  ;;  %2832 = vmatpush3.bf16.msra.mxu0 %v2906_v20 }
0x169f   :  { %v2216_v1 = vpop.f32.mrb[68].mxu0 }
0x16a0   :  { %v2223_v2 = vadd.f32 %v2216_v1, %v3630_v24  ;;  %v2821_v6 = vpop.f32.mrb[69].mxu0 }
0x16a1   :  { %v2219_v9 = vpop.f32.mrb[70].mxu0 }
0x16a2   :  { %v2246_v54 = vadd.f32 %v2244_v63, %v2223_v2  ;;  %v2224_v10 = vadd.f32 %v2219_v9, %v3633_v26  ;;  %v2822_v11 = vpop.f32.mrb[71].mxu0 }
0x16a4   :  { %v2255_v0 = vadd.f32 %v2520_v8, %v2246_v54  ;;  %v2247_v14 = vadd.f32 %v2245_v7, %v2224_v10 }
0x16a6   :  { %v2256_v16 = vadd.f32 %v2520_v8, %v2247_v14  ;;  %v2257_v49 = vmax.f32 %v2255_v0, 0.0 }
0x16a8   :  { %v2258_v57 = vmax.f32 %v2256_v16, 0.0 }
0x16aa   :  { %v2263_v19 = vpack.c.bf16 %v2258_v57, %v2257_v49 }
0x16ac   :  { %2828 = vmatmul.mubr.msk.bf16.vlgmr.msra.gmra.mrb[64].mxu1 %vm290_vm1, %v2263_v19 }
0x177f   :  { %v2320_v46 = vpop.f32.mrb[64].mxu1 }
0x1780   :  { %v2321_v23 = vadd.f32 %v2521_v21, %v2320_v46  ;;  %v2829_v56 = vpop.f32.mrb[65].mxu1 }
0x1781   :  { %v2323_v24 = vpop.f32.mrb[66].mxu1 }
0x1782   :  { %v2324_v13 = vadd.f32 %v2521_v21, %v2323_v24  ;;  %v2830_v25 = vpop.f32.mrb[67].mxu1  ;;  %v2327_v3 = vmax.f32 %v2321_v23, 0.0 }
0x1784   :  { %v2328_v26 = vmax.f32 %v2324_v13, 0.0 }
0x1786   :  { %v2331_v27 = vpack.c.bf16 %v2328_v26, %v2327_v3 }
0x1788   :  { %2834 = vmatmul.mubr.msk.bf16.vlgmr.msra.gmra.mrb[72].mxu0 %vm158_vm4, %v2331_v27 }
0x1789   :  { %2988 = shalt.err (!%p2985_p12)
}
0x178a   :  { %s2989_s6 = scalar_lea.hbm %s3253_s4, 256 }
0x178b   :  { %p2990_p13 = scmp.ne.s32.totalorder %s3253_s4, %s2989_s6  ;;  %p2993_p0 = scmp.lt.u32.totalorder %s2989_s6, %s3253_s4 }
0x178d   :  { %p2995_p1 = pnand %p2993_p0, %p2990_p13 }
0x178f   :  { %2998 = shalt.err (!%p2995_p1)
}
0x1790   :  { %s3077_s14 = smov 128   ;;  %s3078_s23 = smov 8   ;;  %v2525_v51 = vld [vmem:[%s3248_s30] ss:$0 sm:$0xff] }
0x1791   :  { %2402 = dma.vmem_to_hbm [thread:$0]  %s2397_s21, 256, %s3253_s4, [#allocation4], %s3077_s14, %s3077_s14, %s3078_s23  }
0x1792   :  { %s3079_s26 = smov [#allocation6]  }
0x1793   :  { %s2408_s28 = sshll.u32 %s3079_s26, 4  ;;  %s2409_s28 = int_to_ptr.vmem [resolvable:$true] %s2408_s28 }
0x1794   :  { %s2999_s1 = scalar_lea.vmem %s2409_s28, 256  ;;  %p3004_p3 = scmp.lt.s32.totalorder %s2409_s28, %s2409_s28 }
0x1795   :  { %p3000_p2 = scmp.ne.s32.totalorder %s2409_s28, %s2999_s1  ;;  %p3005_p4 = scmp.lt.s32.totalorder %s2999_s1, %s2999_s1 }
0x1797   :  { %p3006_p5 = por %p3005_p4, %p3004_p3 }
0x1799   :  { %p3007_p6 = pnand %p3006_p5, %p3000_p2 }
0x185b   :  { %v2382_v22 = vpop.f32.mrb[72].mxu0 }
0x185c   :  { %v2383_v40 = vadd.f32 %v2525_v51, %v2382_v22  ;;  %v2835_v28 = vpop.f32.mrb[73].mxu0 }
0x185d   :  { %v2385_v29 = vpop.f32.mrb[74].mxu0 }
0x185e   :  { %2389 = vst.msk [vmem:[#allocation6] sm:$0xff] %vm158_vm4, %v2383_v40  ;;  %v2386_v30 = vadd.f32 %v2525_v51, %v2385_v29  ;;  %v2836_v31 = vpop.f32.mrb[75].mxu0 }
0x1860   :  { %2390 = vst.msk [vmem:[#allocation6 + $0x8] sm:$0xff] %vm158_vm4, %v2386_v30 }
0x1861   :  { %3010 = shalt.err (!%p3007_p6)
}
0x1862   :  { %s3011_s30 = scalar_lea.hbm %s3258_s25, 256 }
0x1863   :  { %p3012_p7 = scmp.ne.s32.totalorder %s3258_s25, %s3011_s30  ;;  %p3015_p8 = scmp.lt.u32.totalorder %s3011_s30, %s3258_s25 }
0x1865   :  { %p3017_p9 = pnand %p3015_p8, %p3012_p7 }
0x1867   :  { %3020 = shalt.err (!%p3017_p9)
}
0x1868   :  { %2414 = dma.vmem_to_hbm [thread:$0]  %s2409_s28, 256, %s3258_s25, [#allocation7], %s3077_s14, %s3077_s14, %s3078_s23  }
0x1869   :  { %3023 = dma.done.wait [#allocation4], 256  }
0x186a   :  { %3024 = vsyncadd [#allocation4], 4294967040 }
0x186b   :  { %3025 = dma.done.wait [#allocation7], 256  }
0x186c   :  { %3026 = vsyncadd [#allocation7], 4294967040 }
0x186d   :  { %2421 = vsyncpa [#allocation3], 1 }
0x186e   :  { %2422 = vsyncpa [#allocation4], 1 }
0x186f   :  { %2423 = vsyncpa [#allocation7], 1 }

</bundles_post_ra>
